<compile_context>
chip_gen: v7x
topology: tpu7x:2x2x1
jax: 0.10.0
libtpu: 0.0.40
codegen_flags: <defaults>
</compile_context>

<pallas_src>
import functools

import jax
import jax.numpy as jnp
from jax import lax
from jax.experimental import pallas as pl
from jax.experimental.pallas import tpu as pltpu


# -----------------------------------------------------------------------------
# Pallas kernel: TB samples per grid step, three GEMMs + two LeakyReLUs.
# -----------------------------------------------------------------------------
def _bcn_kernel(x_ref, w1_ref, b1_ref, w2_ref, b2_ref, w3_ref, b3_ref,
                out_ref, *, alpha):
    f32 = jnp.float32

    # GEMM1: Edge2Edge + Edge2Node folded into one affine map (dropout(eval)=id),
    # bf16 operands, f32 accumulation on the MXU.
    h1 = jnp.dot(x_ref[...], w1_ref[...],
                 preferred_element_type=f32) + b1_ref[...]        # (TB, G*D)
    h1 = jnp.where(h1 > 0, h1, alpha * h1)                        # LeakyReLU

    # GEMM2: Node2Graph as one matmul; NG is zero-padded to a lane-dense 128
    # columns in the wrapper so h2 is (TB, 128) with no misaligned layout.
    h2 = jnp.dot(h1.astype(w2_ref.dtype), w2_ref[...],
                 preferred_element_type=f32) + b2_ref[...]        # (TB, NGP)
    h2 = jnp.where(h2 > 0, h2, alpha * h2)                        # LeakyReLU

    # GEMM3: BatchNorm1d(eval) folded into the FC layer.  Contract on the last
    # axis of both operands (A @ B^T form) so Mosaic folds the transpose into
    # the MXU operand push -- no explicit h2.T relayout.  Output is (OUTP, TB),
    # lane-dense and a full 8-sublane unmasked store.
    out_ref[...] = lax.dot_general(
        w3_ref[...], h2, (((1,), (1,)), ((), ())),
        preferred_element_type=f32) + b3_ref[...]                 # (OUTP, TB)


# -----------------------------------------------------------------------------
# One-time weight folding (call once, OUTSIDE the per-step jitted path).
# -----------------------------------------------------------------------------
def fold_bcn_params(p, dim, matmul_dtype=jnp.bfloat16):
    """Fold e2e + e2n (analytically), n2g, and BN(eval)+FC into three matrices.

    Returns a dict with:
      w1: (D*D, G*D)   [matmul_dtype]   b1: (1, G*D)  [f32]
      w2: (G*D, NGP)   [matmul_dtype]   b2: (1, NGP)  [f32]   NGP = pad(NG,128)
      w3: (OUTP, NGP)  [f32]            b3: (OUTP, 1) [f32]   OUTP = pad(OUT,8)
    """
    f32 = jnp.float32
    D = dim
    wr1 = p["e2e_row_w"][:, 0, 0, :].astype(f32)        # (F, D)   [f, b]
    wc1 = p["e2e_col_w"][:, 0, :, 0].astype(f32)        # (F, D)   [f, a]
    br1, bc1 = p["e2e_row_b"].astype(f32), p["e2e_col_b"].astype(f32)
    wr2 = p["e2n_row_w"][:, :, 0, :].astype(f32)        # (G, F, D) [g, f, j]
    wc2 = p["e2n_col_w"][:, :, :, 0].astype(f32)        # (G, F, D) [g, f, a]
    br2, bc2 = p["e2n_row_b"].astype(f32), p["e2n_col_b"].astype(f32)
    G = wr2.shape[0]

    # Analytic outer-sum / Kronecker structure of the e2e+e2n composition:
    #   h1[g,i] = sum_{a,b} x[a,b] * W1[(a,b),(g,i)] + b1[g]
    #   W1[(a,b),(g,i)] = A[g,b]*[i==a] + Dm[g,a]*[i==b] + B[g,a,b] + C[g,a,b]
    Sr = wr2.sum(-1)                                    # (G, F)
    Sc = wc2.sum(-1)                                    # (G, F)
    A = Sr @ wr1                                        # (G, D)
    Dm = Sc @ wc1                                       # (G, D)
    B = jnp.einsum('fa,gfb->gab', wc1, wr2)             # (G, D, D)
    C = jnp.einsum('fb,gfa->gab', wr1, wc2)             # (G, D, D)
    eye = jnp.eye(D, dtype=f32)
    w1 = (jnp.broadcast_to((B + C).transpose(1, 2, 0)[:, :, :, None],
                           (D, D, G, D))
          + jnp.einsum('ai,gb->abgi', eye, A)
          + jnp.einsum('bi,ga->abgi', eye, Dm)).reshape(D * D, G * D)
    b1 = br2 + bc2 + (br1 + bc1) @ (Sr + Sc).T          # (G,)
    b1 = jnp.broadcast_to(b1[:, None], (G, D)).reshape(1, G * D)

    # Node2Graph as one matmul, zero-padded to 128 lane-dense columns.
    wn = p["n2g_w"][:, :, :, 0].astype(f32)             # (NG, G, D)
    NG = wn.shape[0]
    KH = G * D
    NGP = max(128, -(-NG // 128) * 128)
    w2 = jnp.zeros((KH, NGP), f32).at[:, :NG].set(wn.reshape(NG, KH).T)
    b2 = jnp.zeros((1, NGP), f32).at[0, :NG].set(p["n2g_b"].astype(f32))

    # BatchNorm1d (eval, running stats) folded into the FC layer; OUT padded
    # to a full 8-sublane tile (padded rows are zero, sliced off after).
    eps = 1e-5
    inv_std = 1.0 / jnp.sqrt(p["bn_rv"].astype(f32) + eps)
    scale = p["bn_gamma"].astype(f32) * inv_std
    shift = p["bn_beta"].astype(f32) - p["bn_rm"].astype(f32) * scale
    fc_w = p["fc_w"].astype(f32)
    fc_b = p["fc_b"].astype(f32)
    OUT = fc_w.shape[0]
    OUTP = -(-OUT // 8) * 8
    w3 = jnp.zeros((OUTP, NGP), f32).at[:OUT, :NG].set(fc_w * scale[None, :])
    b3 = jnp.zeros((OUTP, 1), f32).at[:OUT, 0].set(fc_w @ shift + fc_b)

    return {
        "w1": w1.astype(matmul_dtype), "b1": b1,
        "w2": w2.astype(matmul_dtype), "b2": b2,
        "w3": w3, "b3": b3,
    }


def _pick_tb(n, tb):
    if tb is not None:
        return tb
    # Largest of {1024, 512, 256} that still leaves >= 2 grid steps (so v7x's
    # two TensorCores both get work); 256 keeps the MXU M-dim full otherwise.
    for cand in (1024, 512, 256):
        if n >= 2 * cand:
            return cand
    return 256


# -----------------------------------------------------------------------------
# Per-call forward: reshape/cast + one pallas_call (weights already folded).
# -----------------------------------------------------------------------------
def bcn_forward(x_nchw, folded, *, alpha, out_dim, tb=None):
    N, C, D, D2 = x_nchw.shape
    assert C == 1 and D == D2
    DD = D * D
    w1, b1 = folded["w1"], folded["b1"]
    w2, b2 = folded["w2"], folded["b2"]
    w3, b3 = folded["w3"], folded["b3"]
    OUTP = w3.shape[0]

    x_flat = x_nchw[:, 0, :, :].reshape(N, DD).astype(w1.dtype)
    tb = _pick_tb(N, tb)
    const = lambda n: (0, 0)

    out = pl.pallas_call(
        functools.partial(_bcn_kernel, alpha=alpha),
        grid=(pl.cdiv(N, tb),),                         # no wrapper-side pad:
        in_specs=[                                      # Pallas masks the tail
            pl.BlockSpec((tb, DD), lambda n: (n, 0)),   # samples block
            pl.BlockSpec(w1.shape, const),
            pl.BlockSpec(b1.shape, const),
            pl.BlockSpec(w2.shape, const),
            pl.BlockSpec(b2.shape, const),
            pl.BlockSpec(w3.shape, const),
            pl.BlockSpec(b3.shape, const),
        ],
        out_specs=pl.BlockSpec((OUTP, tb), lambda n: (0, n)),   # lane-dense
        out_shape=jax.ShapeDtypeStruct((OUTP, N), jnp.float32),
        compiler_params=pltpu.CompilerParams(
            dimension_semantics=("parallel",)),
    )(x_flat, w1, b1, w2, b2, w3, b3)

    return out[:out_dim, :].T                           # (N, OUT)


# -----------------------------------------------------------------------------
# Deterministic parameter init (xavier-uniform like the PyTorch __init__).
# -----------------------------------------------------------------------------
def _xavier_uniform(key, shape, fan_in, fan_out):
    bound = (6.0 / (fan_in + fan_out)) ** 0.5
    return jax.random.uniform(key, shape, jnp.float32, -bound, bound)


def init_params(key, dim, e2e, e2n, n2g, out_dim):
    ks = jax.random.split(key, 12)
    p = {}
    p["e2e_row_w"] = _xavier_uniform(ks[0], (e2e, 1, 1, dim), 1 * dim, e2e * dim)
    p["e2e_row_b"] = jax.random.uniform(ks[1], (e2e,), jnp.float32, -0.1, 0.1)
    p["e2e_col_w"] = _xavier_uniform(ks[2], (e2e, 1, dim, 1), 1 * dim, e2e * dim)
    p["e2e_col_b"] = jax.random.uniform(ks[3], (e2e,), jnp.float32, -0.1, 0.1)
    p["e2n_row_w"] = _xavier_uniform(ks[4], (e2n, e2e, 1, dim), e2e * dim, e2n * dim)
    p["e2n_row_b"] = jax.random.uniform(ks[5], (e2n,), jnp.float32, -0.1, 0.1)
    p["e2n_col_w"] = _xavier_uniform(ks[6], (e2n, e2e, dim, 1), e2e * dim, e2n * dim)
    p["e2n_col_b"] = jax.random.uniform(ks[7], (e2n,), jnp.float32, -0.1, 0.1)
    p["n2g_w"] = _xavier_uniform(ks[8], (n2g, e2n, dim, 1), e2n * dim, n2g * dim)
    p["n2g_b"] = jax.random.uniform(ks[9], (n2g,), jnp.float32, -0.1, 0.1)
    # BatchNorm1d(n2g): weight=1, bias=0, default running stats (eval mode)
    p["bn_gamma"] = jnp.ones((n2g,), jnp.float32)
    p["bn_beta"] = jnp.zeros((n2g,), jnp.float32)
    p["bn_rm"] = jnp.zeros((n2g,), jnp.float32)
    p["bn_rv"] = jnp.ones((n2g,), jnp.float32)
    # Linear(n2g, out_dim)
    p["fc_w"] = _xavier_uniform(ks[10], (out_dim, n2g), n2g, out_dim)
    p["fc_b"] = jax.random.uniform(ks[11], (out_dim,), jnp.float32, -0.1, 0.1)
    return p


# -----------------------------------------------------------------------------
# Pure-JAX reference (mirrors the PyTorch forward, eval mode) for verification.
# -----------------------------------------------------------------------------
def _leaky(v, alpha):
    return jnp.where(v > 0, v, alpha * v)


def reference_forward(x_nchw, p, *, alpha):
    x = x_nchw.astype(jnp.float32)
    row = jnp.einsum('ncij,fcj->nfi', x, p["e2e_row_w"][:, :, 0, :]) \
        + p["e2e_row_b"][None, :, None]
    col = jnp.einsum('ncij,fci->nfj', x, p["e2e_col_w"][:, :, :, 0]) \
        + p["e2e_col_b"][None, :, None]
    x1 = row[:, :, :, None] + col[:, :, None, :]                       # e2e
    row2 = jnp.einsum('nfij,gfj->ngi', x1, p["e2n_row_w"][:, :, 0, :]) \
        + p["e2n_row_b"][None, :, None]
    col2 = jnp.einsum('nfij,gfi->ngj', x1, p["e2n_col_w"][:, :, :, 0]) \
        + p["e2n_col_b"][None, :, None]
    x2 = _leaky(row2 + col2, alpha)                  # e2n + dropout(eval) + lrelu
    x3 = jnp.einsum('ngi,kgi->nk', x2, p["n2g_w"][:, :, :, 0]) + p["n2g_b"][None, :]
    x3 = _leaky(x3, alpha)                                             # n2g + lrelu
    eps = 1e-5
    x4 = (x3 - p["bn_rm"]) / jnp.sqrt(p["bn_rv"] + eps) * p["bn_gamma"] + p["bn_beta"]
    return x4 @ p["fc_w"].T + p["fc_b"][None, :]


if __name__ == "__main__":
    key = jax.random.PRNGKey(0)
    k_x, k_p = jax.random.split(key)

    # Small module dims; batch chosen to exercise a partial (masked) tail block.
    N, DIM = 300, 16
    E2E, E2N, N2G = 4, 8, 16
    ALPHA = 0.33
    OUT_DIM = 1            # for_sex=False

    x = jax.random.normal(k_x, (N, 1, DIM, DIM), jnp.float32)
    params = init_params(k_p, DIM, E2E, E2N, N2G, OUT_DIM)

    # One-time weight folding, hoisted out of the per-call jitted path.
    folded_bf16 = fold_bcn_params(params, DIM)                          # fast path
    folded_f32 = fold_bcn_params(params, DIM, matmul_dtype=jnp.float32)  # check path

    fwd = jax.jit(functools.partial(bcn_forward, alpha=ALPHA, out_dim=OUT_DIM))

    y = fwd(x, folded_bf16)
    jax.block_until_ready(y)

    y_ref = reference_forward(x, params, alpha=ALPHA)
    assert y.shape == (N, OUT_DIM)

    # Structural check (fold + kernel + masked tail block) in f32: tight.
    y_f32 = fwd(x, folded_f32)
    err_f32 = float(jnp.max(jnp.abs(y_f32 - y_ref)))
    assert jnp.allclose(y_f32, y_ref, rtol=1e-3, atol=1e-3), err_f32

    # bf16 fast path: loose tolerance (bf16 operands, K=256 reductions).
    err_bf16 = float(jnp.max(jnp.abs(y - y_ref)))
    assert jnp.allclose(y, y_ref, rtol=1e-1, atol=1e-1), err_bf16

    print("KERNEL_OK")
</pallas_src>

<mosaic_0001>
module attributes {stable_mosaic.version = 11 : i64} {
  func.func @_bcn_kernel(%arg0: i32, %arg1: memref<256x256xbf16, #tpu.memory_space<vmem>>, %arg2: memref<256x128xbf16, #tpu.memory_space<vmem>>, %arg3: memref<1x128xf32, #tpu.memory_space<vmem>>, %arg4: memref<128x128xbf16, #tpu.memory_space<vmem>>, %arg5: memref<1x128xf32, #tpu.memory_space<vmem>>, %arg6: memref<8x128xf32, #tpu.memory_space<vmem>>, %arg7: memref<8x1xf32, #tpu.memory_space<vmem>>, %arg8: memref<8x256xf32, #tpu.memory_space<vmem>>) attributes {dimension_semantics = [#tpu.dimension_semantics<parallel>], iteration_bounds = array<i64: 2>, scalar_prefetch = 0 : i64, scratch_operands = 0 : i64, tpu.core_type = #tpu.core_type<tc>, window_params = [{transform_indices = @transform_0, window_bounds = array<i64: 256, 256>}, {pipeline_mode = #tpu.pipeline_mode<synchronous>, transform_indices = @transform_1, window_bounds = array<i64: 256, 128>}, {pipeline_mode = #tpu.pipeline_mode<synchronous>, transform_indices = @transform_2, window_bounds = array<i64: 1, 128>}, {pipeline_mode = #tpu.pipeline_mode<synchronous>, transform_indices = @transform_3, window_bounds = array<i64: 128, 128>}, {pipeline_mode = #tpu.pipeline_mode<synchronous>, transform_indices = @transform_4, window_bounds = array<i64: 1, 128>}, {pipeline_mode = #tpu.pipeline_mode<synchronous>, transform_indices = @transform_5, window_bounds = array<i64: 8, 128>}, {pipeline_mode = #tpu.pipeline_mode<synchronous>, transform_indices = @transform_6, window_bounds = array<i64: 8, 1>}, {transform_indices = @transform_7, window_bounds = array<i64: 8, 256>}]} {
    %c0 = arith.constant 0 : index
    %c0_0 = arith.constant 0 : index
    %0 = vector.load %arg1[%c0, %c0_0] : memref<256x256xbf16, #tpu.memory_space<vmem>>, vector<256x256xbf16>
    %c0_1 = arith.constant 0 : index
    %c0_2 = arith.constant 0 : index
    %1 = vector.load %arg2[%c0_1, %c0_2] : memref<256x128xbf16, #tpu.memory_space<vmem>>, vector<256x128xbf16>
    %cst = arith.constant dense<0.000000e+00> : vector<256x128xf32>
    %2 = tpu.matmul %0, %1, %cst {dimension_numbers = #tpu.dot_dimension_numbers<[1], [0], [0], [1], [0, 0, 1, 1], [], []>} : vector<256x256xbf16>, vector<256x128xbf16>, vector<256x128xf32> -> vector<256x128xf32>
    %c0_3 = arith.constant 0 : index
    %c0_4 = arith.constant 0 : index
    %3 = vector.load %arg3[%c0_3, %c0_4] : memref<1x128xf32, #tpu.memory_space<vmem>>, vector<1x128xf32>
    %4 = vector.broadcast %3 : vector<1x128xf32> to vector<256x128xf32>
    %5 = arith.addf %2, %4 : vector<256x128xf32>
    %cst_5 = arith.constant 0.000000e+00 : f32
    %6 = vector.broadcast %cst_5 : f32 to vector<256x128xf32>
    %7 = arith.cmpf ogt, %5, %6 : vector<256x128xf32>
    %cst_6 = arith.constant 3.300000e-01 : f32
    %8 = vector.broadcast %cst_6 : f32 to vector<256x128xf32>
    %9 = arith.mulf %8, %5 : vector<256x128xf32>
    %10 = arith.select %7, %5, %9 : vector<256x128xi1>, vector<256x128xf32>
    %11 = arith.truncf %10 : vector<256x128xf32> to vector<256x128xbf16>
    %c0_7 = arith.constant 0 : index
    %c0_8 = arith.constant 0 : index
    %12 = vector.load %arg4[%c0_7, %c0_8] : memref<128x128xbf16, #tpu.memory_space<vmem>>, vector<128x128xbf16>
    %cst_9 = arith.constant dense<0.000000e+00> : vector<256x128xf32>
    %13 = tpu.matmul %11, %12, %cst_9 {dimension_numbers = #tpu.dot_dimension_numbers<[1], [0], [0], [1], [0, 0, 1, 1], [], []>} : vector<256x128xbf16>, vector<128x128xbf16>, vector<256x128xf32> -> vector<256x128xf32>
    %c0_10 = arith.constant 0 : index
    %c0_11 = arith.constant 0 : index
    %14 = vector.load %arg5[%c0_10, %c0_11] : memref<1x128xf32, #tpu.memory_space<vmem>>, vector<1x128xf32>
    %15 = vector.broadcast %14 : vector<1x128xf32> to vector<256x128xf32>
    %16 = arith.addf %13, %15 : vector<256x128xf32>
    %cst_12 = arith.constant 0.000000e+00 : f32
    %17 = vector.broadcast %cst_12 : f32 to vector<256x128xf32>
    %18 = arith.cmpf ogt, %16, %17 : vector<256x128xf32>
    %cst_13 = arith.constant 3.300000e-01 : f32
    %19 = vector.broadcast %cst_13 : f32 to vector<256x128xf32>
    %20 = arith.mulf %19, %16 : vector<256x128xf32>
    %21 = arith.select %18, %16, %20 : vector<256x128xi1>, vector<256x128xf32>
    %c0_14 = arith.constant 0 : index
    %c0_15 = arith.constant 0 : index
    %22 = vector.load %arg6[%c0_14, %c0_15] : memref<8x128xf32, #tpu.memory_space<vmem>>, vector<8x128xf32>
    %cst_16 = arith.constant dense<0.000000e+00> : vector<8x256xf32>
    %23 = tpu.matmul %22, %21, %cst_16 {dimension_numbers = #tpu.dot_dimension_numbers<[1], [1], [0], [0], [0, 0, 1, 0], [], []>} : vector<8x128xf32>, vector<256x128xf32>, vector<8x256xf32> -> vector<8x256xf32>
    %c0_17 = arith.constant 0 : index
    %c0_18 = arith.constant 0 : index
    %24 = vector.load %arg7[%c0_17, %c0_18] : memref<8x1xf32, #tpu.memory_space<vmem>>, vector<8x1xf32>
    %25 = vector.broadcast %24 : vector<8x1xf32> to vector<8x256xf32>
    %26 = arith.addf %23, %25 : vector<8x256xf32>
    %c0_19 = arith.constant 0 : index
    %c0_20 = arith.constant 0 : index
    %27 = vector.load %arg8[%c0_19, %c0_20] : memref<8x256xf32, #tpu.memory_space<vmem>>, vector<8x256xf32>
    tpu.vector_store %arg8[%c0_19, %c0_20], %26 {strides = array<i32>} : memref<8x256xf32, #tpu.memory_space<vmem>>, vector<8x256xf32>,
    return
  }
  func.func @transform_0(%arg0: i32) -> (i32, i32) {
    %c0_i32 = arith.constant 0 : i32
    %c0_i32_0 = arith.constant 0 : i32
    return %arg0, %c0_i32 : i32, i32
  }
  func.func @transform_1(%arg0: i32) -> (i32, i32) {
    %c0_i32 = arith.constant 0 : i32
    %c0_i32_0 = arith.constant 0 : i32
    %c0_i32_1 = arith.constant 0 : i32
    return %c0_i32, %c0_i32_0 : i32, i32
  }
  func.func @transform_2(%arg0: i32) -> (i32, i32) {
    %c0_i32 = arith.constant 0 : i32
    %c0_i32_0 = arith.constant 0 : i32
    %c0_i32_1 = arith.constant 0 : i32
    return %c0_i32, %c0_i32_0 : i32, i32
  }
  func.func @transform_3(%arg0: i32) -> (i32, i32) {
    %c0_i32 = arith.constant 0 : i32
    %c0_i32_0 = arith.constant 0 : i32
    %c0_i32_1 = arith.constant 0 : i32
    return %c0_i32, %c0_i32_0 : i32, i32
  }
  func.func @transform_4(%arg0: i32) -> (i32, i32) {
    %c0_i32 = arith.constant 0 : i32
    %c0_i32_0 = arith.constant 0 : i32
    %c0_i32_1 = arith.constant 0 : i32
    return %c0_i32, %c0_i32_0 : i32, i32
  }
  func.func @transform_5(%arg0: i32) -> (i32, i32) {
    %c0_i32 = arith.constant 0 : i32
    %c0_i32_0 = arith.constant 0 : i32
    %c0_i32_1 = arith.constant 0 : i32
    return %c0_i32, %c0_i32_0 : i32, i32
  }
  func.func @transform_6(%arg0: i32) -> (i32, i32) {
    %c0_i32 = arith.constant 0 : i32
    %c0_i32_0 = arith.constant 0 : i32
    %c0_i32_1 = arith.constant 0 : i32
    return %c0_i32, %c0_i32_0 : i32, i32
  }
  func.func @transform_7(%arg0: i32) -> (i32, i32) {
    %c0_i32 = arith.constant 0 : i32
    %c0_i32_0 = arith.constant 0 : i32
    return %c0_i32, %arg0 : i32, i32
  }
}

</mosaic_0001>

<bundles_post_ra>
// kernel: bcn_forward.1
= control target key start
LH: loop header
LB: loop body
LE: loop exit
PB: predicated region body
PF: predicated region fallthrough
CT: control target
= control target key end

     0   :  { %s2640_s24 = smov 0   ;;  %s2642_s25 = smov 0   ;;  %s3362_s0 = inlined_call_operand.vmem [shape: bf16[300,256], index: 0, kind: input, shape index: {}]   ;;  %s3363_s1 = inlined_call_operand.vmem [shape: bf16[256,128], index: 1, kind: input, shape index: {}]   ;;  %s3364_s2 = inlined_call_operand.vmem [shape: f32[1,128], index: 2, kind: input, shape index: {}]   ;;  %s3365_s3 = inlined_call_operand.vmem [shape: bf16[128,128], index: 3, kind: input, shape index: {}]   ;;  %s3366_s4 = inlined_call_operand.vmem [shape: f32[1,128], index: 4, kind: input, shape index: {}]   ;;  %s3367_s5 = inlined_call_operand.vmem [shape: f32[8,128], index: 5, kind: input, shape index: {}]   ;;  %s3368_s6 = inlined_call_operand.vmem [shape: f32[8,1], index: 6, kind: input, shape index: {}]   ;;  %s3369_s7 = inlined_call_operand.vmem [shape: f32[8,300], index: 7, kind: output, shape index: {}]  }
   0x1   :  { %s2644_s26 = smov 0  }
   0x2 LB: > { %s2653_s27 = sadd.s32 4294967295, %s2531_s26   ;;  %s2655_s28 = sadd.s32 1, %s2531_s26   ;;  %s2531_s26 = sphi %s2644_s26, %s3384_s26   ;;  %s2527_s25 = sphi %s2642_s25, %s3383_s25   ;;  %s2523_s24 = sphi %s2640_s24, %s3382_s24  }
   0x3   : > { %s173_s29 = ssub.s32 %s2531_s26, %s2655_s28  ;;  %s176_s30 = sadd.s32 1, %s2527_s25 }
   0x4   : > { %p174_p0 = scmp.eq.s32.totalorder %s173_s29, 0  ;;  %p186_p1 = scmp.ne.s32.totalorder %s2527_s25, %s2523_s24 }
   0x5   : > { %p187_p2 = scmp.eq.s32.totalorder %s2653_s27, 1  ;;  %p1869_p3 = scmp.ge.s32.totalorder %s2531_s26, 1 }
   0x6   : > { %s2663_s8 = scalar_select %p174_p0, %s2527_s25, %s176_s30  }
   0x7   : > { %p2665_p4 = por %p187_p2, %p186_p1  ;;  %p249_p5 = scmp.lt.s32.totalorder %s2531_s26, 3 }
   0x9   : > { %p250_p6 = pnand %p1869_p3, %p249_p5 }
   0xa   : > { %v2373_v0 = vld [vmem:[%s3363_s1 + $0x40] sm:$0xff] (!%p250_p6)   ;;  %s1871_s12 = sshll.u32 (!%p250_p6), %s2653_s27, 5  ;;  %v2375_v2 = vld [vmem:[%s3363_s1 + $0x48] sm:$0xff] (!%p250_p6)   ;;  %v2377_v4 = vld [vmem:[%s3363_s1 + $0x50] sm:$0xff] (!%p250_p6)   ;;  %s283_s21 = sand.u32 (!%p250_p6), 1, %s2523_s24  }
   0xb   : > { %253 = sbr.rel (%p250_p6) target bundleno = 1006 (0x3ee), region = 48  ;;  %v2374_v1 = vld [vmem:[%s3363_s1] sm:$0xff] (!%p250_p6)   ;;  %1967 = vmatprep.subr.bf16.mxu0 (!%p250_p6), %v2373_v0  ;;  %v2376_v3 = vld [vmem:[%s3363_s1 + $0x8] sm:$0xff] (!%p250_p6)   ;;  %p292_p7 = scmp.lt.s32.totalorder (!%p250_p6), %s1871_s12, 37  ;;  %v2378_v5 = vld [vmem:[%s3363_s1 + $0x10] sm:$0xff] (!%p250_p6)  }
   0xc   : > { %1968 = vmatpush3.bf16.msra.mxu0 (!%p250_p6), %v2374_v1  ;;  %v2379_v6 = vld [vmem:[%s3363_s1 + $0x58] sm:$0xff] (!%p250_p6)   ;;  %v2381_v8 = vld [vmem:[%s3363_s1 + $0x60] sm:$0xff] (!%p250_p6)   ;;  %v2383_v10 = vld [vmem:[%s3363_s1 + $0x68] sm:$0xff] (!%p250_p6)   ;;  %s1870_s22 = sshll.u32 (!%p250_p6), %s283_s21, 4 }
   0xd   : > { %1969 = vmatprep.subr.bf16.mxu0 (!%p250_p6), %v2375_v2  ;;  %v2380_v7 = vld [vmem:[%s3363_s1 + $0x18] sm:$0xff] (!%p250_p6)   ;;  %v2382_v9 = vld [vmem:[%s3363_s1 + $0x20] sm:$0xff] (!%p250_p6)   ;;  %v2384_v12 = vld [vmem:[%s3363_s1 + $0x28] sm:$0xff] (!%p250_p6)   ;;  %s2936_s23 = scalar_lea.vmem (!%p250_p6), [#allocation2], %s1870_s22  }
   0xe   : > { %v2385_v13 = vld [vmem:[%s3363_s1 + $0x70] sm:$0xff] (!%p250_p6)   ;;  %v2387_v15 = vld [vmem:[%s3363_s1 + $0x78] sm:$0xff] (!%p250_p6)   ;;  %v2437_v21 = vld [vmem:[%s3365_s3] sm:$0xff] (!%p250_p6)  }
   0xf   : > { %v2386_v14 = vld [vmem:[%s3363_s1 + $0x30] sm:$0xff] (!%p250_p6)   ;;  %v2388_v16 = vld [vmem:[%s3363_s1 + $0x38] sm:$0xff] (!%p250_p6)   ;;  %v2438_v22 = vld [vmem:[%s3365_s3 + $0x8] sm:$0xff] (!%p250_p6)   ;;  %2137 = vmatprep.subr.bf16.mxu1 (!%p250_p6), %v2437_v21 }
  0x10   : > { %1970 = vmatpush3.bf16.msra.mxu0 (!%p250_p6), %v2376_v3  ;;  %v2439_v23 = vld [vmem:[%s3365_s3 + $0x10] sm:$0xff] (!%p250_p6)   ;;  %2138 = vmatpush3.bf16.msra.mxu1 (!%p250_p6), %v2437_v21  ;;  %v2440_v42 = vld [vmem:[%s3365_s3 + $0x18] sm:$0xff] (!%p250_p6)   ;;  %v2441_v45 = vld [vmem:[%s3365_s3 + $0x20] sm:$0xff] (!%p250_p6)  }
  0x11   : > { %1971 = vmatprep.subr.bf16.mxu0 (!%p250_p6), %v2377_v4  ;;  %2139 = vmatprep.subr.bf16.mxu1 (!%p250_p6), %v2438_v22  ;;  %v2442_v46 = vld [vmem:[%s3365_s3 + $0x28] sm:$0xff] (!%p250_p6)   ;;  %v2443_v49 = vld [vmem:[%s3365_s3 + $0x30] sm:$0xff] (!%p250_p6)   ;;  %v2444_v50 = vld [vmem:[%s3365_s3 + $0x38] sm:$0xff] (!%p250_p6)  }
  0x12   : > { %s3386_s12 = smov (!%p292_p7, %s1871_s12), 37  ;;  %v2782_v57 = vld [vmem:[%s3364_s2] ss:$0 sm:$0xff]  ;;  %s1933_s26 = sshll.u32 (%p2665_p4), %s2653_s27, 1 }
  0x13   : > { %s1961_s10 = sshll.u32 %s3386_s12, 3  ;;  %s1962_s29 = sshll.u32 (%p2665_p4), %s2653_s27, 4 }
  0x14   : > { %1972 = vmatpush3.bf16.msra.mxu0 %v2378_v5  ;;  %s2700_s16 = scalar_lea.vmem %s3362_s0, %s1961_s10  ;;  %2140 = vmatpush3.bf16.msra.mxu1 %v2438_v22  ;;  %s1325_s24 = ssub.s32 (%p2665_p4), 3, %s1933_s26 }
  0x15   : > { %1973 = vmatprep.subr.bf16.mxu0 %v2379_v6  ;;  %v2391_v11 = vld [vmem:[%s2700_s16 + $0x4] ss:$8 sps:$4 sm:$0xff]   ;;  %v2389_v17 = vld [vmem:[%s2700_s16] ss:$8 sps:$4 sm:$0xff]   ;;  %v2392_v18 = vld [vmem:[%s2700_s16 + $0x14] ss:$8 sps:$4 sm:$0xff]   ;;  %2141 = vmatprep.subr.bf16.mxu1 %v2439_v23  ;;  %s2947_s11 = scalar_lea.vmem (%p2665_p4), %s3369_s7, %s1962_s29  }
  0x16   : > { %668 = vmatprep.mubr.bf16.mxu0 %v2391_v11  ;;  %v2394_v19 = vld [vmem:[%s2700_s16 + $0x10] ss:$8 sps:$4 sm:$0xff]   ;;  %v2395_v20 = vld [vmem:[%s2700_s16 + $0x24] ss:$8 sps:$4 sm:$0xff]   ;;  %v2397_v24 = vld [vmem:[%s2700_s16 + $0x20] ss:$8 sps:$4 sm:$0xff]  }
  0x17   : > { %v2398_v25 = vld [vmem:[%s2700_s16 + $0x34] ss:$8 sps:$4 sm:$0xff]   ;;  %v2400_v26 = vld [vmem:[%s2700_s16 + $0x30] ss:$8 sps:$4 sm:$0xff]   ;;  %v2401_v27 = vld [vmem:[%s2700_s16 + $0x44] ss:$8 sps:$4 sm:$0xff]  }
  0x18   : > { %1974 = vmatpush3.bf16.msra.mxu0 %v2380_v7  ;;  %2142 = vmatpush3.bf16.msra.mxu1 %v2439_v23  ;;  %v2403_v28 = vld [vmem:[%s2700_s16 + $0x40] ss:$8 sps:$4 sm:$0xff]   ;;  %v2404_v29 = vld [vmem:[%s2700_s16 + $0x54] ss:$8 sps:$4 sm:$0xff]   ;;  %v2406_v30 = vld [vmem:[%s2700_s16 + $0x50] ss:$8 sps:$4 sm:$0xff]  }
  0x19   : > { %1975 = vmatprep.subr.bf16.mxu0 %v2381_v8  ;;  %v2407_v31 = vld [vmem:[%s2700_s16 + $0x64] ss:$8 sps:$4 sm:$0xff]   ;;  %v2409_v32 = vld [vmem:[%s2700_s16 + $0x60] ss:$8 sps:$4 sm:$0xff]   ;;  %v2410_v33 = vld [vmem:[%s2700_s16 + $0x74] ss:$8 sps:$4 sm:$0xff]   ;;  %2143 = vmatprep.subr.bf16.mxu1 %v2440_v42 }
  0x1a   : > { %v2412_v34 = vld [vmem:[%s2700_s16 + $0x70] ss:$8 sps:$4 sm:$0xff]   ;;  %v2413_v35 = vld [vmem:[%s2700_s16 + $0x84] ss:$8 sps:$4 sm:$0xff]   ;;  %v2415_v36 = vld [vmem:[%s2700_s16 + $0x80] ss:$8 sps:$4 sm:$0xff]  }
  0x1b   : > { %v2416_v37 = vld [vmem:[%s2700_s16 + $0x94] ss:$8 sps:$4 sm:$0xff]   ;;  %v2418_v38 = vld [vmem:[%s2700_s16 + $0x90] ss:$8 sps:$4 sm:$0xff]   ;;  %v2419_v39 = vld [vmem:[%s2700_s16 + $0xa4] ss:$8 sps:$4 sm:$0xff]  }
  0x1c   : > { %1976 = vmatpush3.bf16.msra.mxu0 %v2382_v9  ;;  %v2421_v40 = vld [vmem:[%s2700_s16 + $0xa0] ss:$8 sps:$4 sm:$0xff]   ;;  %v2422_v41 = vld [vmem:[%s2700_s16 + $0xb4] ss:$8 sps:$4 sm:$0xff]   ;;  %v2424_v43 = vld [vmem:[%s2700_s16 + $0xb0] ss:$8 sps:$4 sm:$0xff]   ;;  %2144 = vmatpush3.bf16.msra.mxu1 %v2440_v42 }
  0x1d   : > { %1977 = vmatprep.subr.bf16.mxu0 %v2383_v10  ;;  %v2425_v44 = vld [vmem:[%s2700_s16 + $0xc4] ss:$8 sps:$4 sm:$0xff]   ;;  %2145 = vmatprep.subr.bf16.mxu1 %v2441_v45  ;;  %v2427_v47 = vld [vmem:[%s2700_s16 + $0xc0] ss:$8 sps:$4 sm:$0xff]   ;;  %v2428_v48 = vld [vmem:[%s2700_s16 + $0xd4] ss:$8 sps:$4 sm:$0xff]  }
  0x1e   : > { %v2430_v51 = vld [vmem:[%s2700_s16 + $0xd0] ss:$8 sps:$4 sm:$0xff]   ;;  %v2431_v52 = vld [vmem:[%s2700_s16 + $0xe4] ss:$8 sps:$4 sm:$0xff]   ;;  %v2433_v53 = vld [vmem:[%s2700_s16 + $0xe0] ss:$8 sps:$4 sm:$0xff]  }
  0x1f   : > { %v2434_v54 = vld [vmem:[%s2700_s16 + $0xf4] ss:$8 sps:$4 sm:$0xff]   ;;  %v2436_v55 = vld [vmem:[%s2700_s16 + $0xf0] ss:$8 sps:$4 sm:$0xff]   ;;  %p1326_p8 = scmp.lt.s32.totalorder (%p2665_p4), %s1325_s24, 2 }
  0x20   : > { %1978 = vmatpush3.bf16.msra.mxu0 %v2384_v12  ;;  %2146 = vmatpush3.bf16.msra.mxu1 %v2441_v45 }
  0x21   : > { %1979 = vmatprep.subr.bf16.mxu0 %v2385_v13  ;;  %2147 = vmatprep.subr.bf16.mxu1 %v2442_v46 }
  0x24   : > { %1980 = vmatpush3.bf16.msra.mxu0 %v2386_v14  ;;  %2148 = vmatpush3.bf16.msra.mxu1 %v2442_v46 }
  0x25   : > { %1981 = vmatprep.subr.bf16.mxu0 %v2387_v15  ;;  %2149 = vmatprep.subr.bf16.mxu1 %v2443_v49 }
  0x28   : > { %1982 = vmatpush3.bf16.msra.mxu0 %v2388_v16  ;;  %2150 = vmatpush3.bf16.msra.mxu1 %v2443_v49 }
  0x29   : > { %2151 = vmatprep.subr.bf16.mxu1 %v2444_v50 }
  0x2b   : > { %669 = vmatmul.mubr.bf16.vlgmr.msra.gmra.mrb[0].mxu0 %v2389_v17 }
  0x2c   : > { %676 = vmatprep.mubr.bf16.mxu0 %v2392_v18  ;;  %2152 = vmatpush3.bf16.msra.mxu1 %v2444_v50 }
  0x33   : > { %677 = vmatmul.mubr.bf16.gmra.mrb[4].mxu0 %v2394_v19 }
  0x34   : > { %684 = vmatprep.mubr.bf16.mxu0 %v2395_v20 }
  0x3b   : > { %685 = vmatmul.mubr.bf16.gmra.mrb[8].mxu0 %v2397_v24 }
  0x3c   : > { %692 = vmatprep.mubr.bf16.mxu0 %v2398_v25 }
  0x43   : > { %693 = vmatmul.mubr.bf16.gmra.mrb[12].mxu0 %v2400_v26 }
  0x44   : > { %700 = vmatprep.mubr.bf16.mxu0 %v2401_v27 }
  0x4b   : > { %701 = vmatmul.mubr.bf16.gmra.mrb[16].mxu0 %v2403_v28 }
  0x4c   : > { %708 = vmatprep.mubr.bf16.mxu0 %v2404_v29 }
  0x53   : > { %709 = vmatmul.mubr.bf16.gmra.mrb[20].mxu0 %v2406_v30 }
  0x54   : > { %716 = vmatprep.mubr.bf16.mxu0 %v2407_v31 }
  0x5b   : > { %717 = vmatmul.mubr.bf16.gmra.mrb[24].mxu0 %v2409_v32 }
  0x5c   : > { %724 = vmatprep.mubr.bf16.mxu0 %v2410_v33 }
  0x63   : > { %725 = vmatmul.mubr.bf16.gmra.mrb[28].mxu0 %v2412_v34 }
  0x64   : > { %732 = vmatprep.mubr.bf16.mxu0 %v2413_v35 }
  0x6b   : > { %733 = vmatmul.mubr.bf16.gmra.mrb[32].mxu0 %v2415_v36 }
  0x6c   : > { %740 = vmatprep.mubr.bf16.mxu0 %v2416_v37 }
  0x73   : > { %741 = vmatmul.mubr.bf16.gmra.mrb[36].mxu0 %v2418_v38 }
  0x74   : > { %748 = vmatprep.mubr.bf16.mxu0 %v2419_v39 }
  0x7b   : > { %749 = vmatmul.mubr.bf16.gmra.mrb[40].mxu0 %v2421_v40 }
  0x7c   : > { %756 = vmatprep.mubr.bf16.mxu0 %v2422_v41 }
  0x83   : > { %757 = vmatmul.mubr.bf16.gmra.mrb[44].mxu0 %v2424_v43 }
  0x84   : > { %764 = vmatprep.mubr.bf16.mxu0 %v2425_v44 }
  0x8b   : > { %765 = vmatmul.mubr.bf16.gmra.mrb[48].mxu0 %v2427_v47 }
  0x8c   : > { %772 = vmatprep.mubr.bf16.mxu0 %v2428_v48 }
  0x93   : > { %773 = vmatmul.mubr.bf16.gmra.mrb[52].mxu0 %v2430_v51 }
  0x94   : > { %780 = vmatprep.mubr.bf16.mxu0 %v2431_v52 }
  0x9b   : > { %781 = vmatmul.mubr.bf16.gmra.mrb[56].mxu0 %v2433_v53 }
  0x9c   : > { %788 = vmatprep.mubr.bf16.mxu0 %v2434_v54 }
  0xa3   : > { %789 = vmatmul.mubr.bf16.gmra.mrb[60].mxu0 %v2436_v55 }
  0xfe   : > { %v1983_v56 = vpop.f32.mrb[0].mxu0 }
  0xff   : > { %v1984_v58 = vpop.f32.mrb[1].mxu0 }
 0x100   : > { %v1985_v59 = vadd.f32 %v1984_v58, %v1983_v56  ;;  %v1986_v60 = vpop.f32.mrb[2].mxu0 }
 0x101   : > { %v1987_v61 = vpop.f32.mrb[3].mxu0 }
 0x102   : > { %v671_v62 = vadd.f32 %v1985_v59, %v2782_v57  ;;  %v1988_v63 = vadd.f32 %v1987_v61, %v1986_v60 }
 0x104   : > { %v674_v0 = vadd.f32 %v1988_v63, %v2782_v57  ;;  %v829_v1 = vmul.f32 0.33, %v671_v62  ;;  %vm797_vm0 = vcmp.gt.f32.partialorder %v671_v62, 0.0 }
 0x106   : > { %v1989_v2 = vpop.f32.mrb[4].mxu0  ;;  %vm798_vm1 = vcmp.gt.f32.partialorder %v674_v0, 0.0  ;;  %v830_v3 = vmul.f32 0.33, %v674_v0  ;;  %v861_v7 = vsel %vm797_vm0, %v671_v62, %v829_v1 }
 0x107   : > { %v1990_v4 = vpop.f32.mrb[5].mxu0 }
 0x108   : > { %v1991_v5 = vadd.f32 %v1990_v4, %v1989_v2  ;;  %v1992_v6 = vpop.f32.mrb[6].mxu0  ;;  %v862_v8 = vsel %vm798_vm1, %v674_v0, %v830_v3 }
 0x109   : > { %v1993_v9 = vpop.f32.mrb[7].mxu0  ;;  %v893_v10 = vpack.c.bf16 %v862_v8, %v861_v7 }
 0x10a   : > { %v679_v11 = vadd.f32 %v1991_v5, %v2782_v57  ;;  %v1994_v12 = vadd.f32 %v1993_v9, %v1992_v6 }
 0x10b   : > { %2153 = vmatprep.mubr.bf16.mxu1 %v893_v10 }
 0x10c   : > { %v831_v13 = vmul.f32 0.33, %v679_v11  ;;  %v682_v14 = vadd.f32 %v1994_v12, %v2782_v57  ;;  %vm799_vm2 = vcmp.gt.f32.partialorder %v679_v11, 0.0 }
 0x10e   : > { %vm800_vm3 = vcmp.gt.f32.partialorder %v682_v14, 0.0  ;;  %v832_v15 = vmul.f32 0.33, %v682_v14  ;;  %v1995_v16 = vpop.f32.mrb[8].mxu0  ;;  %v863_v20 = vsel %vm799_vm2, %v679_v11, %v831_v13 }
 0x10f   : > { %v1996_v17 = vpop.f32.mrb[9].mxu0 }
 0x110   : > { %v1997_v18 = vadd.f32 %v1996_v17, %v1995_v16  ;;  %v1998_v19 = vpop.f32.mrb[10].mxu0  ;;  %v864_v21 = vsel %vm800_vm3, %v682_v14, %v832_v15 }
 0x111   : > { %v1999_v22 = vpop.f32.mrb[11].mxu0  ;;  %v894_v23 = vpack.c.bf16 %v864_v21, %v863_v20 }
 0x112   : > { %v687_v24 = vadd.f32 %v1997_v18, %v2782_v57  ;;  %v2000_v25 = vadd.f32 %v1999_v22, %v1998_v19 }
 0x113   : > { %2154 = vmatmul.mubr.bf16.vlgmr.msra.gmra.mrb[0].mxu1 %v894_v23 }
 0x114   : > { %v833_v26 = vmul.f32 0.33, %v687_v24  ;;  %v690_v27 = vadd.f32 %v2000_v25, %v2782_v57  ;;  %vm801_vm4 = vcmp.gt.f32.partialorder %v687_v24, 0.0 }
 0x116   : > { %vm802_vm5 = vcmp.gt.f32.partialorder %v690_v27, 0.0  ;;  %v834_v28 = vmul.f32 0.33, %v690_v27  ;;  %v2001_v29 = vpop.f32.mrb[12].mxu0  ;;  %v865_v33 = vsel %vm801_vm4, %v687_v24, %v833_v26 }
 0x117   : > { %v2002_v30 = vpop.f32.mrb[13].mxu0 }
 0x118   : > { %v2003_v31 = vadd.f32 %v2002_v30, %v2001_v29  ;;  %v2004_v32 = vpop.f32.mrb[14].mxu0  ;;  %v866_v34 = vsel %vm802_vm5, %v690_v27, %v834_v28 }
 0x119   : > { %v2005_v35 = vpop.f32.mrb[15].mxu0  ;;  %v895_v36 = vpack.c.bf16 %v866_v34, %v865_v33 }
 0x11a   : > { %v695_v37 = vadd.f32 %v2003_v31, %v2782_v57  ;;  %v2006_v38 = vadd.f32 %v2005_v35, %v2004_v32 }
 0x11b   : > { %2157 = vmatprep.mubr.bf16.mxu1 %v895_v36 }
 0x11c   : > { %v835_v39 = vmul.f32 0.33, %v695_v37  ;;  %v698_v40 = vadd.f32 %v2006_v38, %v2782_v57  ;;  %vm803_vm6 = vcmp.gt.f32.partialorder %v695_v37, 0.0 }
 0x11e   : > { %vm804_vm7 = vcmp.gt.f32.partialorder %v698_v40, 0.0  ;;  %v836_v41 = vmul.f32 0.33, %v698_v40  ;;  %v2007_v42 = vpop.f32.mrb[16].mxu0  ;;  %v867_v46 = vsel %vm803_vm6, %v695_v37, %v835_v39 }
 0x11f   : > { %v2008_v43 = vpop.f32.mrb[17].mxu0 }
 0x120   : > { %v2009_v44 = vadd.f32 %v2008_v43, %v2007_v42  ;;  %v2010_v45 = vpop.f32.mrb[18].mxu0  ;;  %v868_v47 = vsel %vm804_vm7, %v698_v40, %v836_v41 }
 0x121   : > { %v2011_v48 = vpop.f32.mrb[19].mxu0  ;;  %v896_v49 = vpack.c.bf16 %v868_v47, %v867_v46 }
 0x122   : > { %v703_v50 = vadd.f32 %v2009_v44, %v2782_v57  ;;  %v2012_v51 = vadd.f32 %v2011_v48, %v2010_v45 }
 0x123   : > { %2158 = vmatmul.mubr.bf16.gmra.mrb[4].mxu1 %v896_v49 }
 0x124   : > { %v837_v52 = vmul.f32 0.33, %v703_v50  ;;  %v706_v53 = vadd.f32 %v2012_v51, %v2782_v57  ;;  %vm805_vm8 = vcmp.gt.f32.partialorder %v703_v50, 0.0 }
 0x126   : > { %vm806_vm9 = vcmp.gt.f32.partialorder %v706_v53, 0.0  ;;  %v838_v54 = vmul.f32 0.33, %v706_v53  ;;  %v2013_v55 = vpop.f32.mrb[20].mxu0  ;;  %v869_v60 = vsel %vm805_vm8, %v703_v50, %v837_v52 }
 0x127   : > { %v2014_v56 = vpop.f32.mrb[21].mxu0 }
 0x128   : > { %v2015_v58 = vadd.f32 %v2014_v56, %v2013_v55  ;;  %v2016_v59 = vpop.f32.mrb[22].mxu0  ;;  %v870_v61 = vsel %vm806_vm9, %v706_v53, %v838_v54 }
 0x129   : > { %v2017_v62 = vpop.f32.mrb[23].mxu0  ;;  %v897_v63 = vpack.c.bf16 %v870_v61, %v869_v60 }
 0x12a   : > { %v711_v0 = vadd.f32 %v2015_v58, %v2782_v57  ;;  %v2018_v1 = vadd.f32 %v2017_v62, %v2016_v59 }
 0x12b   : > { %2161 = vmatprep.mubr.bf16.mxu1 %v897_v63 }
 0x12c   : > { %v839_v2 = vmul.f32 0.33, %v711_v0  ;;  %v714_v3 = vadd.f32 %v2018_v1, %v2782_v57  ;;  %vm807_vm10 = vcmp.gt.f32.partialorder %v711_v0, 0.0 }
 0x12e   : > { %vm808_vm11 = vcmp.gt.f32.partialorder %v714_v3, 0.0  ;;  %v840_v4 = vmul.f32 0.33, %v714_v3  ;;  %v2019_v5 = vpop.f32.mrb[24].mxu0  ;;  %v871_v9 = vsel %vm807_vm10, %v711_v0, %v839_v2 }
 0x12f   : > { %v2020_v6 = vpop.f32.mrb[25].mxu0 }
 0x130   : > { %v2021_v7 = vadd.f32 %v2020_v6, %v2019_v5  ;;  %v2022_v8 = vpop.f32.mrb[26].mxu0  ;;  %v872_v10 = vsel %vm808_vm11, %v714_v3, %v840_v4 }
 0x131   : > { %v2023_v11 = vpop.f32.mrb[27].mxu0  ;;  %v898_v12 = vpack.c.bf16 %v872_v10, %v871_v9 }
 0x132   : > { %v719_v13 = vadd.f32 %v2021_v7, %v2782_v57  ;;  %v2024_v14 = vadd.f32 %v2023_v11, %v2022_v8 }
 0x133   : > { %2162 = vmatmul.mubr.bf16.gmra.mrb[8].mxu1 %v898_v12 }
 0x134   : > { %v841_v15 = vmul.f32 0.33, %v719_v13  ;;  %v722_v16 = vadd.f32 %v2024_v14, %v2782_v57  ;;  %vm809_vm12 = vcmp.gt.f32.partialorder %v719_v13, 0.0 }
 0x136   : > { %vm810_vm13 = vcmp.gt.f32.partialorder %v722_v16, 0.0  ;;  %v842_v17 = vmul.f32 0.33, %v722_v16  ;;  %v2025_v18 = vpop.f32.mrb[28].mxu0  ;;  %v873_v22 = vsel %vm809_vm12, %v719_v13, %v841_v15 }
 0x137   : > { %v2026_v19 = vpop.f32.mrb[29].mxu0 }
 0x138   : > { %v2027_v20 = vadd.f32 %v2026_v19, %v2025_v18  ;;  %v2028_v21 = vpop.f32.mrb[30].mxu0  ;;  %v874_v23 = vsel %vm810_vm13, %v722_v16, %v842_v17 }
 0x139   : > { %v2029_v24 = vpop.f32.mrb[31].mxu0  ;;  %v899_v25 = vpack.c.bf16 %v874_v23, %v873_v22 }
 0x13a   : > { %v727_v26 = vadd.f32 %v2027_v20, %v2782_v57  ;;  %v2030_v27 = vadd.f32 %v2029_v24, %v2028_v21 }
 0x13b   : > { %2165 = vmatprep.mubr.bf16.mxu1 %v899_v25 }
 0x13c   : > { %v843_v28 = vmul.f32 0.33, %v727_v26  ;;  %v730_v29 = vadd.f32 %v2030_v27, %v2782_v57  ;;  %vm811_vm14 = vcmp.gt.f32.partialorder %v727_v26, 0.0 }
 0x13e   : > { %vm812_vm15 = vcmp.gt.f32.partialorder %v730_v29, 0.0  ;;  %v844_v30 = vmul.f32 0.33, %v730_v29  ;;  %v2031_v31 = vpop.f32.mrb[32].mxu0  ;;  %v875_v35 = vsel %vm811_vm14, %v727_v26, %v843_v28 }
 0x13f   : > { %v2032_v32 = vpop.f32.mrb[33].mxu0 }
 0x140   : > { %v2033_v33 = vadd.f32 %v2032_v32, %v2031_v31  ;;  %v2034_v34 = vpop.f32.mrb[34].mxu0  ;;  %v876_v36 = vsel %vm812_vm15, %v730_v29, %v844_v30 }
 0x141   : > { %v2035_v37 = vpop.f32.mrb[35].mxu0  ;;  %v900_v38 = vpack.c.bf16 %v876_v36, %v875_v35 }
 0x142   : > { %v735_v39 = vadd.f32 %v2033_v33, %v2782_v57  ;;  %v2036_v40 = vadd.f32 %v2035_v37, %v2034_v34 }
 0x143   : > { %2166 = vmatmul.mubr.bf16.gmra.mrb[12].mxu1 %v900_v38 }
 0x144   : > { %v845_v41 = vmul.f32 0.33, %v735_v39  ;;  %v738_v42 = vadd.f32 %v2036_v40, %v2782_v57  ;;  %vm813_vm0 = vcmp.gt.f32.partialorder %v735_v39, 0.0 }
 0x146   : > { %vm814_vm1 = vcmp.gt.f32.partialorder %v738_v42, 0.0  ;;  %v846_v43 = vmul.f32 0.33, %v738_v42  ;;  %v2037_v44 = vpop.f32.mrb[36].mxu0  ;;  %v877_v48 = vsel %vm813_vm0, %v735_v39, %v845_v41 }
 0x147   : > { %v2038_v45 = vpop.f32.mrb[37].mxu0 }
 0x148   : > { %v2039_v46 = vadd.f32 %v2038_v45, %v2037_v44  ;;  %v2040_v47 = vpop.f32.mrb[38].mxu0  ;;  %v878_v49 = vsel %vm814_vm1, %v738_v42, %v846_v43 }
 0x149   : > { %v2041_v50 = vpop.f32.mrb[39].mxu0  ;;  %v901_v51 = vpack.c.bf16 %v878_v49, %v877_v48 }
 0x14a   : > { %v743_v52 = vadd.f32 %v2039_v46, %v2782_v57  ;;  %v2042_v53 = vadd.f32 %v2041_v50, %v2040_v47 }
 0x14b   : > { %2169 = vmatprep.mubr.bf16.mxu1 %v901_v51 }
 0x14c   : > { %v847_v54 = vmul.f32 0.33, %v743_v52  ;;  %v746_v55 = vadd.f32 %v2042_v53, %v2782_v57  ;;  %vm815_vm2 = vcmp.gt.f32.partialorder %v743_v52, 0.0 }
 0x14e   : > { %vm816_vm3 = vcmp.gt.f32.partialorder %v746_v55, 0.0  ;;  %v848_v56 = vmul.f32 0.33, %v746_v55  ;;  %v2043_v58 = vpop.f32.mrb[40].mxu0  ;;  %v879_v62 = vsel %vm815_vm2, %v743_v52, %v847_v54 }
 0x14f   : > { %v2044_v59 = vpop.f32.mrb[41].mxu0 }
 0x150   : > { %v2045_v60 = vadd.f32 %v2044_v59, %v2043_v58  ;;  %v2046_v61 = vpop.f32.mrb[42].mxu0  ;;  %v880_v63 = vsel %vm816_vm3, %v746_v55, %v848_v56 }
 0x151   : > { %v2047_v0 = vpop.f32.mrb[43].mxu0  ;;  %v902_v1 = vpack.c.bf16 %v880_v63, %v879_v62 }
 0x152   : > { %v751_v2 = vadd.f32 %v2045_v60, %v2782_v57  ;;  %v2048_v3 = vadd.f32 %v2047_v0, %v2046_v61 }
 0x153   : > { %2170 = vmatmul.mubr.bf16.gmra.mrb[16].mxu1 %v902_v1 }
 0x154   : > { %v849_v4 = vmul.f32 0.33, %v751_v2  ;;  %v754_v5 = vadd.f32 %v2048_v3, %v2782_v57  ;;  %vm817_vm4 = vcmp.gt.f32.partialorder %v751_v2, 0.0 }
 0x156   : > { %vm818_vm5 = vcmp.gt.f32.partialorder %v754_v5, 0.0  ;;  %v850_v6 = vmul.f32 0.33, %v754_v5  ;;  %v2049_v7 = vpop.f32.mrb[44].mxu0  ;;  %v881_v11 = vsel %vm817_vm4, %v751_v2, %v849_v4 }
 0x157   : > { %v2050_v8 = vpop.f32.mrb[45].mxu0 }
 0x158   : > { %v2051_v9 = vadd.f32 %v2050_v8, %v2049_v7  ;;  %v2052_v10 = vpop.f32.mrb[46].mxu0  ;;  %v882_v12 = vsel %vm818_vm5, %v754_v5, %v850_v6 }
 0x159   : > { %v2053_v13 = vpop.f32.mrb[47].mxu0  ;;  %v903_v14 = vpack.c.bf16 %v882_v12, %v881_v11  ;;  %v2819_v12 = vld [vmem:[%s3366_s4] ss:$0 sm:$0xff] }
 0x15a   : > { %v759_v15 = vadd.f32 %v2051_v9, %v2782_v57  ;;  %v2054_v16 = vadd.f32 %v2053_v13, %v2052_v10 }
 0x15b   : > { %2173 = vmatprep.mubr.bf16.mxu1 %v903_v14 }
 0x15c   : > { %v851_v17 = vmul.f32 0.33, %v759_v15  ;;  %v762_v18 = vadd.f32 %v2054_v16, %v2782_v57  ;;  %vm819_vm6 = vcmp.gt.f32.partialorder %v759_v15, 0.0 }
 0x15e   : > { %vm820_vm7 = vcmp.gt.f32.partialorder %v762_v18, 0.0  ;;  %v852_v19 = vmul.f32 0.33, %v762_v18  ;;  %v2055_v20 = vpop.f32.mrb[48].mxu0  ;;  %v883_v24 = vsel %vm819_vm6, %v759_v15, %v851_v17 }
 0x15f   : > { %v2056_v21 = vpop.f32.mrb[49].mxu0 }
 0x160   : > { %v2057_v22 = vadd.f32 %v2056_v21, %v2055_v20  ;;  %v2058_v23 = vpop.f32.mrb[50].mxu0  ;;  %v884_v25 = vsel %vm820_vm7, %v762_v18, %v852_v19 }
 0x161   : > { %v2059_v26 = vpop.f32.mrb[51].mxu0  ;;  %v904_v27 = vpack.c.bf16 %v884_v25, %v883_v24 }
 0x162   : > { %v767_v28 = vadd.f32 %v2057_v22, %v2782_v57  ;;  %v2060_v29 = vadd.f32 %v2059_v26, %v2058_v23  ;;  %v2828_v22 = vld [vmem:[%s3367_s5] sm:$0xff] }
 0x163   : > { %2174 = vmatmul.mubr.bf16.gmra.mrb[20].mxu1 %v904_v27 }
 0x164   : > { %v853_v30 = vmul.f32 0.33, %v767_v28  ;;  %v770_v31 = vadd.f32 %v2060_v29, %v2782_v57  ;;  %vm821_vm8 = vcmp.gt.f32.partialorder %v767_v28, 0.0 }
 0x166   : > { %vm822_vm9 = vcmp.gt.f32.partialorder %v770_v31, 0.0  ;;  %v854_v32 = vmul.f32 0.33, %v770_v31  ;;  %v2061_v33 = vpop.f32.mrb[52].mxu0  ;;  %v885_v37 = vsel %vm821_vm8, %v767_v28, %v853_v30 }
 0x167   : > { %v2062_v34 = vpop.f32.mrb[53].mxu0 }
 0x168   : > { %v2063_v35 = vadd.f32 %v2062_v34, %v2061_v33  ;;  %v2064_v36 = vpop.f32.mrb[54].mxu0  ;;  %v886_v38 = vsel %vm822_vm9, %v770_v31, %v854_v32  ;;  %v1238_v31 = vld [vmem:[%s3368_s6] sm:$0xff]  ;;  %v2597_v32 = vmov 0  }
 0x169   : > { %v2065_v39 = vpop.f32.mrb[55].mxu0  ;;  %v905_v40 = vpack.c.bf16 %v886_v38, %v885_v37  ;;  %2372 = vset.pattern.permute.xlu0 %v2597_v32 }
 0x16a   : > { %v775_v41 = vadd.f32 %v2063_v35, %v2782_v57  ;;  %v2066_v42 = vadd.f32 %v2065_v39, %v2064_v36  ;;  %1241 = vperm.xlu0 %2372, %v1238_v31  }
 0x16b   : > { %2177 = vmatprep.mubr.bf16.mxu1 %v905_v40 }
 0x16c   : > { %v855_v43 = vmul.f32 0.33, %v775_v41  ;;  %v778_v44 = vadd.f32 %v2066_v42, %v2782_v57  ;;  %vm823_vm10 = vcmp.gt.f32.partialorder %v775_v41, 0.0 }
 0x16e   : > { %vm824_vm11 = vcmp.gt.f32.partialorder %v778_v44, 0.0  ;;  %v856_v45 = vmul.f32 0.33, %v778_v44  ;;  %v2067_v46 = vpop.f32.mrb[56].mxu0  ;;  %v887_v50 = vsel %vm823_vm10, %v775_v41, %v855_v43 }
 0x16f   : > { %v2068_v47 = vpop.f32.mrb[57].mxu0 }
 0x170   : > { %v2069_v48 = vadd.f32 %v2068_v47, %v2067_v46  ;;  %v2070_v49 = vpop.f32.mrb[58].mxu0  ;;  %v888_v51 = vsel %vm824_vm11, %v778_v44, %v856_v45 }
 0x171   : > { %v2071_v52 = vpop.f32.mrb[59].mxu0  ;;  %v906_v53 = vpack.c.bf16 %v888_v51, %v887_v50 }
 0x172   : > { %v783_v54 = vadd.f32 %v2069_v48, %v2782_v57  ;;  %v2072_v55 = vadd.f32 %v2071_v52, %v2070_v49 }
 0x173   : > { %2178 = vmatmul.mubr.bf16.gmra.mrb[24].mxu1 %v906_v53 }
 0x174   : > { %v857_v56 = vmul.f32 0.33, %v783_v54  ;;  %v786_v58 = vadd.f32 %v2072_v55, %v2782_v57  ;;  %vm825_vm12 = vcmp.gt.f32.partialorder %v783_v54, 0.0 }
 0x176   : > { %vm826_vm13 = vcmp.gt.f32.partialorder %v786_v58, 0.0  ;;  %v858_v59 = vmul.f32 0.33, %v786_v58  ;;  %v2073_v60 = vpop.f32.mrb[60].mxu0  ;;  %v889_v0 = vsel %vm825_vm12, %v783_v54, %v857_v56 }
 0x177   : > { %v2074_v61 = vpop.f32.mrb[61].mxu0 }
 0x178   : > { %v2075_v62 = vadd.f32 %v2074_v61, %v2073_v60  ;;  %v2076_v63 = vpop.f32.mrb[62].mxu0  ;;  %v890_v1 = vsel %vm826_vm13, %v786_v58, %v858_v59 }
 0x179   : > { %v2077_v2 = vpop.f32.mrb[63].mxu0  ;;  %v907_v3 = vpack.c.bf16 %v890_v1, %v889_v0 }
 0x17a   : > { %v791_v4 = vadd.f32 %v2075_v62, %v2782_v57  ;;  %v2078_v5 = vadd.f32 %v2077_v2, %v2076_v63 }
 0x17b   : > { %2181 = vmatprep.mubr.bf16.mxu1 %v907_v3 }
 0x17c   : > { %v859_v6 = vmul.f32 0.33, %v791_v4  ;;  %v794_v7 = vadd.f32 %v2078_v5, %v2782_v57  ;;  %vm827_vm14 = vcmp.gt.f32.partialorder %v791_v4, 0.0 }
 0x17e   : > { %vm828_vm15 = vcmp.gt.f32.partialorder %v794_v7, 0.0  ;;  %v860_v8 = vmul.f32 0.33, %v794_v7  ;;  %v891_v9 = vsel %vm827_vm14, %v791_v4, %v859_v6 }
 0x180   : > { %v892_v10 = vsel %vm828_vm15, %v794_v7, %v860_v8 }
 0x181   : > { %v908_v11 = vpack.c.bf16 %v892_v10, %v891_v9 }
 0x183   : > { %2182 = vmatmul.mubr.bf16.gmra.mrb[28].mxu1 %v908_v11 }
 0x184   : > { %2135 = vmatprep.mubr.f32.mxu1 %v2828_v22 }
 0x1e6   : > { %v2155_v13 = vpop.f32.mrb[0].mxu1 }
 0x1e7   : > { %v1023_v14 = vadd.f32 %v2155_v13, %v2819_v12  ;;  %v1014_v15 = vpop.f32.mrb[1].mxu1 }
 0x1e8   : > { %v1015_v16 = vadd.f32 %v2819_v12, %v1014_v15  ;;  %v2156_v17 = vpop.f32.mrb[2].mxu1 }
 0x1e9   : > { %v1175_v57 = vmul.f32 0.33, %v1023_v14  ;;  %v1026_v18 = vadd.f32 %v2156_v17, %v2819_v12  ;;  %v1017_v19 = vpop.f32.mrb[3].mxu1  ;;  %vm1143_vm0 = vcmp.gt.f32.partialorder %v1023_v14, 0.0 }
 0x1ea   : > { %v1173_v20 = vmul.f32 0.33, %v1015_v16  ;;  %v1018_v21 = vadd.f32 %v2819_v12, %v1017_v19  ;;  %vm1141_vm1 = vcmp.gt.f32.partialorder %v1015_v16, 0.0 }
 0x1eb   : > { %vm1144_vm2 = vcmp.gt.f32.partialorder %v1026_v18, 0.0  ;;  %v1176_v23 = vmul.f32 0.33, %v1026_v18  ;;  %v2831_v25 = vsel %vm1143_vm0, %v1023_v14, %v1175_v57 }
 0x1ec   : > { %vm1142_vm3 = vcmp.gt.f32.partialorder %v1018_v21, 0.0  ;;  %v1174_v24 = vmul.f32 0.33, %v1018_v21  ;;  %v2835_v27 = vsel %vm1141_vm1, %v1015_v16, %v1173_v20 }
 0x1ed   : > { %v2833_v26 = vsel %vm1144_vm2, %v1026_v18, %v1176_v23 }
 0x1ee   : > { %v2191_v28 = vpack.c.bf16 %v2833_v26, %v2831_v25  ;;  %v2839_v29 = vsel %vm1142_vm3, %v1018_v21, %v1174_v24 }
 0x1ef   : > { %v2187_v30 = vpack.c.bf16 %v2839_v29, %v2835_v27 }
 0x1f6   : > { %v2159_v33 = vpop.f32.mrb[4].mxu1 }
 0x1f7   : > { %v1039_v34 = vadd.f32 %v2159_v33, %v2819_v12  ;;  %v1030_v35 = vpop.f32.mrb[5].mxu1 }
 0x1f8   : > { %v1031_v36 = vadd.f32 %v2819_v12, %v1030_v35  ;;  %v2160_v37 = vpop.f32.mrb[6].mxu1 }
 0x1f9   : > { %v1179_v38 = vmul.f32 0.33, %v1039_v34  ;;  %v1042_v39 = vadd.f32 %v2160_v37, %v2819_v12  ;;  %v1033_v40 = vpop.f32.mrb[7].mxu1  ;;  %vm1147_vm4 = vcmp.gt.f32.partialorder %v1039_v34, 0.0 }
 0x1fa   : > { %v1177_v41 = vmul.f32 0.33, %v1031_v36  ;;  %v1034_v42 = vadd.f32 %v2819_v12, %v1033_v40  ;;  %vm1145_vm5 = vcmp.gt.f32.partialorder %v1031_v36, 0.0 }
 0x1fb   : > { %vm1148_vm6 = vcmp.gt.f32.partialorder %v1042_v39, 0.0  ;;  %v1180_v43 = vmul.f32 0.33, %v1042_v39  ;;  %v2850_v45 = vsel %vm1147_vm4, %v1039_v34, %v1179_v38 }
 0x1fc   : > { %vm1146_vm7 = vcmp.gt.f32.partialorder %v1034_v42, 0.0  ;;  %v1178_v44 = vmul.f32 0.33, %v1034_v42  ;;  %v2854_v47 = vsel %vm1145_vm5, %v1031_v36, %v1177_v41 }
 0x1fd   : > { %v2852_v46 = vsel %vm1148_vm6, %v1042_v39, %v1180_v43 }
 0x1fe   : > { %v2199_v48 = vpack.c.bf16 %v2852_v46, %v2850_v45  ;;  %v2858_v49 = vsel %vm1146_vm7, %v1034_v42, %v1178_v44 }
 0x1ff   : > { %v2195_v50 = vpack.c.bf16 %v2858_v49, %v2854_v47 }
 0x206   : > { %v2163_v51 = vpop.f32.mrb[8].mxu1 }
 0x207   : > { %v1055_v52 = vadd.f32 %v2163_v51, %v2819_v12  ;;  %v1046_v53 = vpop.f32.mrb[9].mxu1 }
 0x208   : > { %v1047_v54 = vadd.f32 %v2819_v12, %v1046_v53  ;;  %v2164_v55 = vpop.f32.mrb[10].mxu1 }
 0x209   : > { %v1183_v56 = vmul.f32 0.33, %v1055_v52  ;;  %v1058_v58 = vadd.f32 %v2164_v55, %v2819_v12  ;;  %v1049_v59 = vpop.f32.mrb[11].mxu1  ;;  %vm1151_vm8 = vcmp.gt.f32.partialorder %v1055_v52, 0.0 }
 0x20a   : > { %v1181_v60 = vmul.f32 0.33, %v1047_v54  ;;  %v1050_v61 = vadd.f32 %v2819_v12, %v1049_v59  ;;  %vm1149_vm9 = vcmp.gt.f32.partialorder %v1047_v54, 0.0 }
 0x20b   : > { %vm1152_vm10 = vcmp.gt.f32.partialorder %v1058_v58, 0.0  ;;  %v1184_v62 = vmul.f32 0.33, %v1058_v58  ;;  %v2866_v0 = vsel %vm1151_vm8, %v1055_v52, %v1183_v56 }
 0x20c   : > { %vm1150_vm11 = vcmp.gt.f32.partialorder %v1050_v61, 0.0  ;;  %v1182_v63 = vmul.f32 0.33, %v1050_v61  ;;  %v2870_v2 = vsel %vm1149_vm9, %v1047_v54, %v1181_v60 }
 0x20d   : > { %v2868_v1 = vsel %vm1152_vm10, %v1058_v58, %v1184_v62 }
 0x20e   : > { %v2207_v3 = vpack.c.bf16 %v2868_v1, %v2866_v0  ;;  %v2874_v4 = vsel %vm1150_vm11, %v1050_v61, %v1182_v63 }
 0x20f   : > { %v2203_v5 = vpack.c.bf16 %v2874_v4, %v2870_v2 }
 0x216   : > { %v2167_v6 = vpop.f32.mrb[12].mxu1 }
 0x217   : > { %v1071_v7 = vadd.f32 %v2167_v6, %v2819_v12  ;;  %v1062_v8 = vpop.f32.mrb[13].mxu1 }
 0x218   : > { %v1063_v9 = vadd.f32 %v2819_v12, %v1062_v8  ;;  %v2168_v10 = vpop.f32.mrb[14].mxu1 }
 0x219   : > { %v1187_v11 = vmul.f32 0.33, %v1071_v7  ;;  %v1074_v13 = vadd.f32 %v2168_v10, %v2819_v12  ;;  %v1065_v14 = vpop.f32.mrb[15].mxu1  ;;  %vm1155_vm12 = vcmp.gt.f32.partialorder %v1071_v7, 0.0 }
 0x21a   : > { %v1185_v15 = vmul.f32 0.33, %v1063_v9  ;;  %v1066_v16 = vadd.f32 %v2819_v12, %v1065_v14  ;;  %vm1153_vm13 = vcmp.gt.f32.partialorder %v1063_v9, 0.0 }
 0x21b   : > { %vm1156_vm14 = vcmp.gt.f32.partialorder %v1074_v13, 0.0  ;;  %v1188_v17 = vmul.f32 0.33, %v1074_v13  ;;  %v2882_v18 = vsel %vm1155_vm12, %v1071_v7, %v1187_v11 }
 0x21c   : > { %vm1154_vm15 = vcmp.gt.f32.partialorder %v1066_v16, 0.0  ;;  %v1186_v57 = vmul.f32 0.33, %v1066_v16  ;;  %v2886_v20 = vsel %vm1153_vm13, %v1063_v9, %v1185_v15 }
 0x21d   : > { %v2884_v19 = vsel %vm1156_vm14, %v1074_v13, %v1188_v17 }
 0x21e   : > { %v2215_v21 = vpack.c.bf16 %v2884_v19, %v2882_v18  ;;  %v2890_v23 = vsel %vm1154_vm15, %v1066_v16, %v1186_v57 }
 0x21f   : > { %v2211_v24 = vpack.c.bf16 %v2890_v23, %v2886_v20 }
 0x226   : > { %v2171_v31 = vpop.f32.mrb[16].mxu1 }
 0x227   : > { %v1087_v32 = vadd.f32 %v2171_v31, %v2819_v12  ;;  %v1078_v33 = vpop.f32.mrb[17].mxu1 }
 0x228   : > { %v1079_v34 = vadd.f32 %v2819_v12, %v1078_v33  ;;  %v2172_v35 = vpop.f32.mrb[18].mxu1 }
 0x229   : > { %v1191_v36 = vmul.f32 0.33, %v1087_v32  ;;  %v1090_v37 = vadd.f32 %v2172_v35, %v2819_v12  ;;  %v1081_v38 = vpop.f32.mrb[19].mxu1  ;;  %vm1159_vm0 = vcmp.gt.f32.partialorder %v1087_v32, 0.0 }
 0x22a   : > { %v1189_v39 = vmul.f32 0.33, %v1079_v34  ;;  %v1082_v40 = vadd.f32 %v2819_v12, %v1081_v38  ;;  %vm1157_vm1 = vcmp.gt.f32.partialorder %v1079_v34, 0.0 }
 0x22b   : > { %vm1160_vm2 = vcmp.gt.f32.partialorder %v1090_v37, 0.0  ;;  %v1192_v41 = vmul.f32 0.33, %v1090_v37  ;;  %v1223_v43 = vsel %vm1159_vm0, %v1087_v32, %v1191_v36 }
 0x22c   : > { %vm1158_vm3 = vcmp.gt.f32.partialorder %v1082_v40, 0.0  ;;  %v1190_v42 = vmul.f32 0.33, %v1082_v40  ;;  %v1221_v51 = vsel %vm1157_vm1, %v1079_v34, %v1189_v39 }
 0x22d   : > { %v1224_v44 = vsel %vm1160_vm2, %v1090_v37, %v1192_v41 }
 0x22e   : > { %v1222_v52 = vsel %vm1158_vm3, %v1082_v40, %v1190_v42  ;;  %v2189_v53 = vpack.c.bf16 %v1224_v44, %v1223_v43 }
 0x22f   : > { %v2185_v54 = vpack.c.bf16 %v1222_v52, %v1221_v51 }
 0x231   : > { %2186 = vmatprep.subr.bf16.mxu1 %v2185_v54 }
 0x232   : > { %2188 = vmatpush3.bf16.xpose.msra.mxu1 %v2187_v30 }
 0x233   : > { %2190 = vmatprep.subr.bf16.mxu1 %v2189_v53 }
 0x236   : > { %v2175_v55 = vpop.f32.mrb[20].mxu1 }
 0x237   : > { %v1103_v56 = vadd.f32 %v2175_v55, %v2819_v12  ;;  %v1094_v58 = vpop.f32.mrb[21].mxu1 }
 0x238   : > { %v1095_v59 = vadd.f32 %v2819_v12, %v1094_v58  ;;  %v2176_v60 = vpop.f32.mrb[22].mxu1 }
 0x239   : > { %v1195_v61 = vmul.f32 0.33, %v1103_v56  ;;  %v1106_v62 = vadd.f32 %v2176_v60, %v2819_v12  ;;  %v1097_v63 = vpop.f32.mrb[23].mxu1  ;;  %vm1163_vm4 = vcmp.gt.f32.partialorder %v1103_v56, 0.0 }
 0x23a   : > { %v1193_v6 = vmul.f32 0.33, %v1095_v59  ;;  %v1098_v7 = vadd.f32 %v2819_v12, %v1097_v63  ;;  %2192 = vmatpush3.bf16.xpose.msra.mxu1 %v2191_v28  ;;  %vm1161_vm5 = vcmp.gt.f32.partialorder %v1095_v59, 0.0 }
 0x23b   : > { %vm1164_vm6 = vcmp.gt.f32.partialorder %v1106_v62, 0.0  ;;  %v1196_v27 = vmul.f32 0.33, %v1106_v62  ;;  %v1227_v30 = vsel %vm1163_vm4, %v1103_v56, %v1195_v61 }
 0x23c   : > { %vm1162_vm7 = vcmp.gt.f32.partialorder %v1098_v7, 0.0  ;;  %v1194_v29 = vmul.f32 0.33, %v1098_v7  ;;  %v1225_v9 = vsel %vm1161_vm5, %v1095_v59, %v1193_v6 }
 0x23d   : > { %v1228_v8 = vsel %vm1164_vm6, %v1106_v62, %v1196_v27 }
 0x23e   : > { %v1226_v10 = vsel %vm1162_vm7, %v1098_v7, %v1194_v29  ;;  %v2197_v11 = vpack.c.bf16 %v1228_v8, %v1227_v30 }
 0x23f   : > { %v2193_v13 = vpack.c.bf16 %v1226_v10, %v1225_v9 }
 0x241   : > { %2194 = vmatprep.subr.bf16.mxu1 %v2193_v13 }
 0x242   : > { %2196 = vmatpush3.bf16.xpose.msra.mxu1 %v2195_v50 }
 0x243   : > { %2198 = vmatprep.subr.bf16.mxu1 %v2197_v11 }
 0x246   : > { %v2179_v14 = vpop.f32.mrb[24].mxu1 }
 0x247   : > { %v1119_v25 = vadd.f32 %v2179_v14, %v2819_v12  ;;  %v1110_v26 = vpop.f32.mrb[25].mxu1 }
 0x248   : > { %v1111_v28 = vadd.f32 %v2819_v12, %v1110_v26  ;;  %v2180_v15 = vpop.f32.mrb[26].mxu1 }
 0x249   : > { %v1199_v16 = vmul.f32 0.33, %v1119_v25  ;;  %v1122_v17 = vadd.f32 %v2180_v15, %v2819_v12  ;;  %v1113_v57 = vpop.f32.mrb[27].mxu1  ;;  %vm1167_vm8 = vcmp.gt.f32.partialorder %v1119_v25, 0.0 }
 0x24a   : > { %v1197_v31 = vmul.f32 0.33, %v1111_v28  ;;  %v1114_v32 = vadd.f32 %v2819_v12, %v1113_v57  ;;  %2200 = vmatpush3.bf16.xpose.msra.mxu1 %v2199_v48  ;;  %vm1165_vm9 = vcmp.gt.f32.partialorder %v1111_v28, 0.0 }
 0x24b   : > { %vm1168_vm10 = vcmp.gt.f32.partialorder %v1122_v17, 0.0  ;;  %v1200_v47 = vmul.f32 0.33, %v1122_v17  ;;  %v1231_v50 = vsel %vm1167_vm8, %v1119_v25, %v1199_v16 }
 0x24c   : > { %vm1166_vm11 = vcmp.gt.f32.partialorder %v1114_v32, 0.0  ;;  %v1198_v49 = vmul.f32 0.33, %v1114_v32  ;;  %v1229_v34 = vsel %vm1165_vm9, %v1111_v28, %v1197_v31 }
 0x24d   : > { %v1232_v33 = vsel %vm1168_vm10, %v1122_v17, %v1200_v47 }
 0x24e   : > { %v1230_v35 = vsel %vm1166_vm11, %v1114_v32, %v1198_v49  ;;  %v2205_v36 = vpack.c.bf16 %v1232_v33, %v1231_v50 }
 0x24f   : > { %v2201_v37 = vpack.c.bf16 %v1230_v35, %v1229_v34 }
 0x251   : > { %2202 = vmatprep.subr.bf16.mxu1 %v2201_v37 }
 0x252   : > { %2204 = vmatpush3.bf16.xpose.msra.mxu1 %v2203_v5 }
 0x253   : > { %2206 = vmatprep.subr.bf16.mxu1 %v2205_v36 }
 0x256   : > { %v2183_v38 = vpop.f32.mrb[28].mxu1 }
 0x257   : > { %v1135_v45 = vadd.f32 %v2183_v38, %v2819_v12  ;;  %v1126_v46 = vpop.f32.mrb[29].mxu1 }
 0x258   : > { %v1127_v48 = vadd.f32 %v2819_v12, %v1126_v46  ;;  %v2184_v39 = vpop.f32.mrb[30].mxu1 }
 0x259   : > { %v1203_v40 = vmul.f32 0.33, %v1135_v45  ;;  %v1138_v41 = vadd.f32 %v2184_v39, %v2819_v12  ;;  %v1129_v42 = vpop.f32.mrb[31].mxu1  ;;  %vm1171_vm12 = vcmp.gt.f32.partialorder %v1135_v45, 0.0 }
 0x25a   : > { %v1201_v43 = vmul.f32 0.33, %v1127_v48  ;;  %v1130_v44 = vadd.f32 %v2819_v12, %v1129_v42  ;;  %2208 = vmatpush3.bf16.xpose.msra.mxu1 %v2207_v3  ;;  %vm1169_vm13 = vcmp.gt.f32.partialorder %v1127_v48, 0.0  ;;  %v1242_v12 = vpop.permute.xlu0 %1241 }
 0x25b   : > { %vm1172_vm14 = vcmp.gt.f32.partialorder %v1138_v41, 0.0  ;;  %v1204_v2 = vmul.f32 0.33, %v1138_v41  ;;  %v1235_v5 = vsel %vm1171_vm12, %v1135_v45, %v1203_v40 }
 0x25c   : > { %vm1170_vm15 = vcmp.gt.f32.partialorder %v1130_v44, 0.0  ;;  %v1202_v4 = vmul.f32 0.33, %v1130_v44  ;;  %v1233_v52 = vsel %vm1169_vm13, %v1127_v48, %v1201_v43 }
 0x25d   : > { %v1236_v51 = vsel %vm1172_vm14, %v1138_v41, %v1204_v2 }
 0x25e   : > { %v1234_v53 = vsel %vm1170_vm15, %v1130_v44, %v1202_v4  ;;  %v2213_v54 = vpack.c.bf16 %v1236_v51, %v1235_v5 }
 0x25f   : > { %v2209_v55 = vpack.c.bf16 %v1234_v53, %v1233_v52 }
 0x261   : > { %2210 = vmatprep.subr.bf16.mxu1 %v2209_v55 }
 0x262   : > { %2212 = vmatpush3.bf16.xpose.msra.mxu1 %v2211_v24 }
 0x263   : > { %2214 = vmatprep.subr.bf16.mxu1 %v2213_v54 }
 0x26a   : > { %2216 = vmatpush3.bf16.xpose.msra.mxu1 %v2215_v21 }
 0x271   : > { %2136 = vmatmul.mubr.f32.vlgmr.msra.gmra.mrb[32].mxu1 %v2828_v22 }
 0x342   : > { %1323 = sbr.rel (!%p2665_p4) target bundleno = 1006 (0x3ee), region = 52 }
 0x344   : > { %v1310_v0 = vpop.f32.mrb[32].mxu1 }
 0x345   : > { %v1311_v1 = vadd.f32 %v1310_v0, %v1242_v12  ;;  %v1312_v3 = vpop.f32.mrb[33].mxu1 }
 0x346   : > { %v1313_v56 = vadd.f32 %v1312_v3, %v1242_v12 }
 0x347   : > { %1315 = vst [vmem:[%s2936_s23] sm:$0xff] %v1311_v1 }
 0x348   : > { %1316 = vst [vmem:[%s2936_s23 + $0x8] sm:$0xff] %v1313_v56 }
 0x349   : > { %s3388_s24 = smov (!%p1326_p8, %s1325_s24), 2 }
 0x34a   : > { %s1934_s13 = sshll.u32 %s3388_s24, 7  ;;  %s2949_s14 = sshll.u32 %s3388_s24, 3 }
 0x34b   : > { %p1938_p9 = scmp.eq.s32.totalorder %s1934_s13, 0 }
 0x34c   : > { %p1336_p10 = scmp.lt.u32.totalorder (!%p1938_p9), %s2949_s14, 8 }
 0x34d   : > { %1335 = sbr.rel (%p1938_p9) target bundleno = 1006 (0x3ee), region = 56 }
 0x354   : > { %1339 = sbr.rel (%p1336_p10) target bundleno = 997 (0x3e5), region = 60  ;;  %s2953_s9 = sand.u32 (!%p1336_p10), 7, %s2949_s14  }
 0x355   : > { %p1355_p11 = scmp.eq.s32.totalorder (!%p1336_p10), %s2953_s9, 0  ;;  %p1939_p12 = scmp.ne.s32.totalorder (!%p1336_p10), %s2953_s9, 0 }
 0x35b   : > { %1358 = sbr.rel (%p1939_p12) target bundleno = 926 (0x39e), region = 75  ;;  %s1359_s27 = sshrl.u32 (!%p1939_p12), %s2949_s14, 3 }
 0x35c   : > { %s2960_s15 = sshrl.u32 (!%p1939_p12), %s1359_s27, 6 }
 0x35d   : > { %p1940_p13 = scmp.le.s32.totalorder (!%p1939_p12), %s2960_s15, 0 }
 0x362   : > { %1794 = sbr.rel (%p1940_p13) target bundleno = 906 (0x38a), region = 156  ;;  %s3371_s16 = smov (!%p1940_p13), %s2947_s11 }
 0x363   : > { %s3372_s17 = smov (!%p1940_p13), %s2936_s23  ;;  %s2969_s18 = smov (!%p1940_p13), 0  }
 0x364   : > { %s2971_s19 = smov (!%p1940_p13), 0  }
 0x369 LB: >> { %v1372_v22 = vld [vmem:[%s2539_s17] sm:$0xff]  ;;  %v1374_v18 = vld [vmem:[%s2539_s17 + $0x8] sm:$0xff]  ;;  %v1376_v19 = vld [vmem:[%s2539_s17 + $0x10] sm:$0xff]  ;;  %s1500_s12 = sadd.s32 1, %s2543_s18  ;;  %s1366_s19 = sadd.s32 1, %s2547_s19   ;;  %s2547_s19 = sphi %s2971_s19, %s1366_s19   ;;  %s2543_s18 = sphi %s2969_s18, %s3375_s18   ;;  %s2539_s17 = sphi %s3372_s17, %s3374_s17   ;;  %s2535_s16 = sphi %s3371_s16, %s3373_s16  }
 0x36a   : >> { %1373 = vst [vmem:[%s2535_s16] sm:$0xff] %v1372_v22  ;;  %1375 = vst [vmem:[%s2535_s16 + $0x8] sm:$0xff] %v1374_v18  ;;  %v1378_v20 = vld [vmem:[%s2539_s17 + $0x18] sm:$0xff]  ;;  %v1380_v21 = vld [vmem:[%s2539_s17 + $0x20] sm:$0xff]  ;;  %p1501_p0 = scmp.ge.s32.totalorder %s1500_s12, %s2960_s15  ;;  %p1365_p1 = scmp.ge.s32.totalorder %s1366_s19, %s2960_s15 }
 0x36b   : >> { %1377 = vst [vmem:[%s2535_s16 + $0x10] sm:$0xff] %v1376_v19  ;;  %v1382_v23 = vld [vmem:[%s2539_s17 + $0x28] sm:$0xff]  ;;  %1379 = vst [vmem:[%s2535_s16 + $0x18] sm:$0xff] %v1378_v20  ;;  %v1384_v24 = vld [vmem:[%s2539_s17 + $0x30] sm:$0xff] }
 0x36c   : >> { %1381 = vst [vmem:[%s2535_s16 + $0x20] sm:$0xff] %v1380_v21  ;;  %1383 = vst [vmem:[%s2535_s16 + $0x28] sm:$0xff] %v1382_v23  ;;  %v1386_v58 = vld [vmem:[%s2539_s17 + $0x38] sm:$0xff]  ;;  %v1388_v59 = vld [vmem:[%s2539_s17 + $0x40] sm:$0xff]  ;;  %s3390_s12 = smov (%p1501_p0, %s1500_s12), 0 }
 0x36d   : >> { %1385 = vst [vmem:[%s2535_s16 + $0x30] sm:$0xff] %v1384_v24  ;;  %1387 = vst [vmem:[%s2535_s16 + $0x38] sm:$0xff] %v1386_v58  ;;  %v1390_v60 = vld [vmem:[%s2539_s17 + $0x48] sm:$0xff]  ;;  %v1392_v61 = vld [vmem:[%s2539_s17 + $0x50] sm:$0xff]  ;;  %s1941_s20 = sshll.u32 %s3390_s12, 9  ;;  %s3375_s18 = smov %s3390_s12 }
 0x36e   : >> { %1389 = vst [vmem:[%s2535_s16 + $0x40] sm:$0xff] %v1388_v59  ;;  %v1394_v62 = vld [vmem:[%s2539_s17 + $0x58] sm:$0xff]  ;;  %1391 = vst [vmem:[%s2535_s16 + $0x48] sm:$0xff] %v1390_v60  ;;  %v1396_v63 = vld [vmem:[%s2539_s17 + $0x60] sm:$0xff]  ;;  %s3027_s21 = scalar_lea.vmem %s2936_s23, %s1941_s20 [#allocation2]   ;;  %s3030_s22 = scalar_lea.vmem %s2947_s11, %s1941_s20  }
 0x36f   : >> { %1393 = vst [vmem:[%s2535_s16 + $0x50] sm:$0xff] %v1392_v61  ;;  %1395 = vst [vmem:[%s2535_s16 + $0x58] sm:$0xff] %v1394_v62  ;;  %v1398_v6 = vld [vmem:[%s2539_s17 + $0x68] sm:$0xff]  ;;  %v1400_v7 = vld [vmem:[%s2539_s17 + $0x70] sm:$0xff] }
 0x370   : >> { %1397 = vst [vmem:[%s2535_s16 + $0x60] sm:$0xff] %v1396_v63  ;;  %1399 = vst [vmem:[%s2535_s16 + $0x68] sm:$0xff] %v1398_v6  ;;  %v1402_v27 = vld [vmem:[%s2539_s17 + $0x78] sm:$0xff]  ;;  %v1404_v29 = vld [vmem:[%s2539_s17 + $0x80] sm:$0xff] }
 0x371   : >> { %1401 = vst [vmem:[%s2535_s16 + $0x70] sm:$0xff] %v1400_v7  ;;  %v1406_v30 = vld [vmem:[%s2539_s17 + $0x88] sm:$0xff]  ;;  %1403 = vst [vmem:[%s2535_s16 + $0x78] sm:$0xff] %v1402_v27  ;;  %v1408_v8 = vld [vmem:[%s2539_s17 + $0x90] sm:$0xff] }
 0x372   : >> { %1405 = vst [vmem:[%s2535_s16 + $0x80] sm:$0xff] %v1404_v29  ;;  %1407 = vst [vmem:[%s2535_s16 + $0x88] sm:$0xff] %v1406_v30  ;;  %v1410_v9 = vld [vmem:[%s2539_s17 + $0x98] sm:$0xff]  ;;  %v1412_v10 = vld [vmem:[%s2539_s17 + $0xa0] sm:$0xff] }
 0x373   : >> { %1409 = vst [vmem:[%s2535_s16 + $0x90] sm:$0xff] %v1408_v8  ;;  %1411 = vst [vmem:[%s2535_s16 + $0x98] sm:$0xff] %v1410_v9  ;;  %v1414_v11 = vld [vmem:[%s2539_s17 + $0xa8] sm:$0xff]  ;;  %v1416_v13 = vld [vmem:[%s2539_s17 + $0xb0] sm:$0xff] }
 0x374   : >> { %1413 = vst [vmem:[%s2535_s16 + $0xa0] sm:$0xff] %v1412_v10  ;;  %v1418_v14 = vld [vmem:[%s2539_s17 + $0xb8] sm:$0xff]  ;;  %1415 = vst [vmem:[%s2535_s16 + $0xa8] sm:$0xff] %v1414_v11  ;;  %v1420_v25 = vld [vmem:[%s2539_s17 + $0xc0] sm:$0xff] }
 0x375   : >> { %1417 = vst [vmem:[%s2535_s16 + $0xb0] sm:$0xff] %v1416_v13  ;;  %1419 = vst [vmem:[%s2535_s16 + $0xb8] sm:$0xff] %v1418_v14  ;;  %v1422_v26 = vld [vmem:[%s2539_s17 + $0xc8] sm:$0xff]  ;;  %v1424_v28 = vld [vmem:[%s2539_s17 + $0xd0] sm:$0xff] }
 0x376   : >> { %1421 = vst [vmem:[%s2535_s16 + $0xc0] sm:$0xff] %v1420_v25  ;;  %1423 = vst [vmem:[%s2535_s16 + $0xc8] sm:$0xff] %v1422_v26  ;;  %v1426_v15 = vld [vmem:[%s2539_s17 + $0xd8] sm:$0xff]  ;;  %v1428_v16 = vld [vmem:[%s2539_s17 + $0xe0] sm:$0xff] }
 0x377   : >> { %1425 = vst [vmem:[%s2535_s16 + $0xd0] sm:$0xff] %v1424_v28  ;;  %v1430_v17 = vld [vmem:[%s2539_s17 + $0xe8] sm:$0xff]  ;;  %1427 = vst [vmem:[%s2535_s16 + $0xd8] sm:$0xff] %v1426_v15  ;;  %v1432_v57 = vld [vmem:[%s2539_s17 + $0xf0] sm:$0xff] }
 0x378   : >> { %1429 = vst [vmem:[%s2535_s16 + $0xe0] sm:$0xff] %v1428_v16  ;;  %1431 = vst [vmem:[%s2535_s16 + $0xe8] sm:$0xff] %v1430_v17  ;;  %v1434_v31 = vld [vmem:[%s2539_s17 + $0xf8] sm:$0xff]  ;;  %v1436_v32 = vld [vmem:[%s2539_s17 + $0x100] sm:$0xff] }
 0x379   : >> { %1433 = vst [vmem:[%s2535_s16 + $0xf0] sm:$0xff] %v1432_v57  ;;  %1435 = vst [vmem:[%s2535_s16 + $0xf8] sm:$0xff] %v1434_v31  ;;  %v1438_v47 = vld [vmem:[%s2539_s17 + $0x108] sm:$0xff]  ;;  %v1440_v49 = vld [vmem:[%s2539_s17 + $0x110] sm:$0xff] }
 0x37a   : >> { %1437 = vst [vmem:[%s2535_s16 + $0x100] sm:$0xff] %v1436_v32  ;;  %v1442_v50 = vld [vmem:[%s2539_s17 + $0x118] sm:$0xff]  ;;  %1439 = vst [vmem:[%s2535_s16 + $0x108] sm:$0xff] %v1438_v47  ;;  %v1444_v33 = vld [vmem:[%s2539_s17 + $0x120] sm:$0xff] }
 0x37b   : >> { %1441 = vst [vmem:[%s2535_s16 + $0x110] sm:$0xff] %v1440_v49  ;;  %1443 = vst [vmem:[%s2535_s16 + $0x118] sm:$0xff] %v1442_v50  ;;  %v1446_v34 = vld [vmem:[%s2539_s17 + $0x128] sm:$0xff]  ;;  %v1448_v35 = vld [vmem:[%s2539_s17 + $0x130] sm:$0xff] }
 0x37c   : >> { %1445 = vst [vmem:[%s2535_s16 + $0x120] sm:$0xff] %v1444_v33  ;;  %1447 = vst [vmem:[%s2535_s16 + $0x128] sm:$0xff] %v1446_v34  ;;  %v1450_v36 = vld [vmem:[%s2539_s17 + $0x138] sm:$0xff]  ;;  %v1452_v37 = vld [vmem:[%s2539_s17 + $0x140] sm:$0xff] }
 0x37d   : >> { %1449 = vst [vmem:[%s2535_s16 + $0x130] sm:$0xff] %v1448_v35  ;;  %v1454_v38 = vld [vmem:[%s2539_s17 + $0x148] sm:$0xff]  ;;  %1451 = vst [vmem:[%s2535_s16 + $0x138] sm:$0xff] %v1450_v36  ;;  %v1456_v45 = vld [vmem:[%s2539_s17 + $0x150] sm:$0xff] }
 0x37e   : >> { %1453 = vst [vmem:[%s2535_s16 + $0x140] sm:$0xff] %v1452_v37  ;;  %1455 = vst [vmem:[%s2535_s16 + $0x148] sm:$0xff] %v1454_v38  ;;  %v1458_v46 = vld [vmem:[%s2539_s17 + $0x158] sm:$0xff]  ;;  %v1460_v48 = vld [vmem:[%s2539_s17 + $0x160] sm:$0xff] }
 0x37f   : >> { %1457 = vst [vmem:[%s2535_s16 + $0x150] sm:$0xff] %v1456_v45  ;;  %1459 = vst [vmem:[%s2535_s16 + $0x158] sm:$0xff] %v1458_v46  ;;  %v1462_v39 = vld [vmem:[%s2539_s17 + $0x168] sm:$0xff]  ;;  %v1464_v40 = vld [vmem:[%s2539_s17 + $0x170] sm:$0xff] }
 0x380   : >> { %1461 = vst [vmem:[%s2535_s16 + $0x160] sm:$0xff] %v1460_v48  ;;  %v1466_v41 = vld [vmem:[%s2539_s17 + $0x178] sm:$0xff]  ;;  %1463 = vst [vmem:[%s2535_s16 + $0x168] sm:$0xff] %v1462_v39  ;;  %v1468_v42 = vld [vmem:[%s2539_s17 + $0x180] sm:$0xff] }
 0x381   : >> { %1465 = vst [vmem:[%s2535_s16 + $0x170] sm:$0xff] %v1464_v40  ;;  %1467 = vst [vmem:[%s2535_s16 + $0x178] sm:$0xff] %v1466_v41  ;;  %v1470_v43 = vld [vmem:[%s2539_s17 + $0x188] sm:$0xff]  ;;  %v1472_v44 = vld [vmem:[%s2539_s17 + $0x190] sm:$0xff] }
 0x382   : >> { %1469 = vst [vmem:[%s2535_s16 + $0x180] sm:$0xff] %v1468_v42  ;;  %1471 = vst [vmem:[%s2535_s16 + $0x188] sm:$0xff] %v1470_v43  ;;  %v1474_v2 = vld [vmem:[%s2539_s17 + $0x198] sm:$0xff]  ;;  %v1476_v4 = vld [vmem:[%s2539_s17 + $0x1a0] sm:$0xff] }
 0x383   : >> { %1473 = vst [vmem:[%s2535_s16 + $0x190] sm:$0xff] %v1472_v44  ;;  %v1478_v5 = vld [vmem:[%s2539_s17 + $0x1a8] sm:$0xff]  ;;  %1475 = vst [vmem:[%s2535_s16 + $0x198] sm:$0xff] %v1474_v2  ;;  %v1480_v51 = vld [vmem:[%s2539_s17 + $0x1b0] sm:$0xff]  ;;  %1368 = sbr.rel (!%p1365_p1) target bundleno = 873 (0x369), region = 162 }
 0x384   : >> { %1477 = vst [vmem:[%s2535_s16 + $0x1a0] sm:$0xff] %v1476_v4  ;;  %1479 = vst [vmem:[%s2535_s16 + $0x1a8] sm:$0xff] %v1478_v5  ;;  %v1482_v52 = vld [vmem:[%s2539_s17 + $0x1b8] sm:$0xff]  ;;  %v1484_v53 = vld [vmem:[%s2539_s17 + $0x1c0] sm:$0xff] }
 0x385   : >> { %1481 = vst [vmem:[%s2535_s16 + $0x1b0] sm:$0xff] %v1480_v51  ;;  %1483 = vst [vmem:[%s2535_s16 + $0x1b8] sm:$0xff] %v1482_v52  ;;  %v1486_v54 = vld [vmem:[%s2539_s17 + $0x1c8] sm:$0xff]  ;;  %v1488_v55 = vld [vmem:[%s2539_s17 + $0x1d0] sm:$0xff] }
 0x386   : >> { %1485 = vst [vmem:[%s2535_s16 + $0x1c0] sm:$0xff] %v1484_v53  ;;  %v1490_v12 = vld [vmem:[%s2539_s17 + $0x1d8] sm:$0xff]  ;;  %1487 = vst [vmem:[%s2535_s16 + $0x1c8] sm:$0xff] %v1486_v54  ;;  %v1492_v0 = vld [vmem:[%s2539_s17 + $0x1e0] sm:$0xff] }
 0x387   : >> { %1489 = vst [vmem:[%s2535_s16 + $0x1d0] sm:$0xff] %v1488_v55  ;;  %1491 = vst [vmem:[%s2535_s16 + $0x1d8] sm:$0xff] %v1490_v12  ;;  %v1494_v1 = vld [vmem:[%s2539_s17 + $0x1e8] sm:$0xff]  ;;  %v1496_v3 = vld [vmem:[%s2539_s17 + $0x1f0] sm:$0xff] }
 0x388   : >> { %1493 = vst [vmem:[%s2535_s16 + $0x1e0] sm:$0xff] %v1492_v0  ;;  %1495 = vst [vmem:[%s2535_s16 + $0x1e8] sm:$0xff] %v1494_v1  ;;  %v1498_v56 = vld [vmem:[%s2539_s17 + $0x1f8] sm:$0xff]  ;;  %s3374_s17 = smov %s3027_s21 }
 0x389   : >> { %1497 = vst [vmem:[%s2535_s16 + $0x1f0] sm:$0xff] %v1496_v3  ;;  %1499 = vst [vmem:[%s2535_s16 + $0x1f8] sm:$0xff] %v1498_v56  ;;  %s3373_s16 = smov %s3030_s22 }
 0x38a PF: > { %s3136_s26 = sand.u32 63, %s1359_s27   ;;  %s1963_s29 = sshll.u32 %s2960_s15, 13 }
 0x38b   : > { %s1511_s24 = sshra.s32 %s1963_s29, 4  ;;  %p1946_p2 = scmp.le.s32.totalorder %s3136_s26, 0 }
 0x38c   : > { %s1512_s30 = scalar_lea.vmem %s2936_s23, %s1511_s24 [#allocation2]   ;;  %s1515_s10 = scalar_lea.vmem %s2947_s11, %s1511_s24  }
 0x38d   : > { %1808 = sbr.rel (%p1946_p2) target bundleno = 926 (0x39e), region = 167  ;;  %s2549_s13 = smov (!%p1946_p2), %s1515_s10  }
 0x38e   : > { %s2553_s12 = smov (!%p1946_p2), %s1512_s30   ;;  %s2557_s20 = smov (!%p1946_p2), 0  }
 0x38f   : > { %s2561_s19 = smov (!%p1946_p2), 0  }
 0x394 LB: >> { %v1527_v22 = vld [vmem:[%s2555_s12] sm:$0xff]  ;;  %s1529_s27 = sadd.s32 1, %s2559_s20  ;;  %s1521_s19 = sadd.s32 1, %s2563_s19   ;;  %s2563_s19 = sphi %s2561_s19, %s1521_s19   ;;  %s2559_s20 = sphi %s2557_s20, %s2558_s20   ;;  %s2555_s12 = sphi %s2553_s12, %s1534_s12   ;;  %s2551_s13 = sphi %s2549_s13, %s1535_s13  }
 0x395   : >> { %1528 = vst [vmem:[%s2551_s13] sm:$0xff] %v1527_v22  ;;  %p1530_p3 = scmp.ge.s32.totalorder %s1529_s27, %s3136_s26  ;;  %p1520_p4 = scmp.ge.s32.totalorder %s1521_s19, %s3136_s26 }
 0x397   : >> { %s3392_s27 = smov (%p1530_p3, %s1529_s27), 0  ;;  %1523 = sbr.rel (!%p1520_p4) target bundleno = 916 (0x394), region = 173 }
 0x398   : >> { %s1947_s15 = sshll.u32 %s3392_s27, 3  ;;  %s2558_s20 = smov %s3392_s27  }
 0x399   : >> { %s1534_s12 = scalar_lea.vmem %s1512_s30, %s1947_s15 [#allocation2]   ;;  %s1535_s13 = scalar_lea.vmem %s1515_s10, %s1947_s15  }
 0x39e PF: > { %1538 = sbr.rel (%p1355_p11) target bundleno = 997 (0x3e5), region = 93  ;;  %s3148_s16 = ssub.s32 (!%p1355_p11), %s2949_s14, %s2953_s9 }
 0x39f   : > { %s1544_s17 = sshrl.u32 (!%p1355_p11), %s2949_s14, 3  ;;  %s1541_s18 = scalar_lea.vmem (!%p1355_p11), %s2936_s23, %s3148_s16 [#allocation2] }
 0x3a0   : > { %s3157_s22 = sshrl.u32 (!%p1355_p11), %s1544_s17, 6 }
 0x3a1   : > { %p1949_p5 = scmp.le.s32.totalorder (!%p1355_p11), %s3157_s22, 0 }
 0x3a5   : > { %1822 = sbr.rel (%p1949_p5) target bundleno = 973 (0x3cd), region = 178  ;;  %s3376_s26 = smov (!%p1949_p5), %s2947_s11 }
 0x3a6   : > { %s3377_s29 = smov (!%p1949_p5), %s2936_s23  ;;  %s3166_s24 = smov (!%p1949_p5), 0  }
 0x3a7   : > { %s3168_s30 = smov (!%p1949_p5), 0  }
 0x3ac LB: >> { %v1557_v18 = vld [vmem:[%s2571_s29] sm:$0xff]  ;;  %v1559_v19 = vld [vmem:[%s2571_s29 + $0x8] sm:$0xff]  ;;  %v1561_v20 = vld [vmem:[%s2571_s29 + $0x10] sm:$0xff]  ;;  %s1685_s10 = sadd.s32 1, %s2575_s24  ;;  %s1551_s30 = sadd.s32 1, %s2579_s30   ;;  %s2579_s30 = sphi %s3168_s30, %s1551_s30   ;;  %s2575_s24 = sphi %s3166_s24, %s3380_s24   ;;  %s2571_s29 = sphi %s3377_s29, %s3379_s29   ;;  %s2567_s26 = sphi %s3376_s26, %s3378_s26  }
 0x3ad   : >> { %1558 = vst [vmem:[%s2567_s26] sm:$0xff] %v1557_v18  ;;  %1560 = vst [vmem:[%s2567_s26 + $0x8] sm:$0xff] %v1559_v19  ;;  %v1563_v21 = vld [vmem:[%s2571_s29 + $0x18] sm:$0xff]  ;;  %v1565_v23 = vld [vmem:[%s2571_s29 + $0x20] sm:$0xff]  ;;  %p1686_p6 = scmp.ge.s32.totalorder %s1685_s10, %s3157_s22  ;;  %p1550_p7 = scmp.ge.s32.totalorder %s1551_s30, %s3157_s22 }
 0x3ae   : >> { %1562 = vst [vmem:[%s2567_s26 + $0x10] sm:$0xff] %v1561_v20  ;;  %v1567_v24 = vld [vmem:[%s2571_s29 + $0x28] sm:$0xff]  ;;  %1564 = vst [vmem:[%s2567_s26 + $0x18] sm:$0xff] %v1563_v21  ;;  %v1569_v58 = vld [vmem:[%s2571_s29 + $0x30] sm:$0xff] }
 0x3af   : >> { %1566 = vst [vmem:[%s2567_s26 + $0x20] sm:$0xff] %v1565_v23  ;;  %1568 = vst [vmem:[%s2567_s26 + $0x28] sm:$0xff] %v1567_v24  ;;  %v1571_v59 = vld [vmem:[%s2571_s29 + $0x38] sm:$0xff]  ;;  %v1573_v60 = vld [vmem:[%s2571_s29 + $0x40] sm:$0xff]  ;;  %s3394_s10 = smov (%p1686_p6, %s1685_s10), 0 }
 0x3b0   : >> { %1570 = vst [vmem:[%s2567_s26 + $0x30] sm:$0xff] %v1569_v58  ;;  %1572 = vst [vmem:[%s2567_s26 + $0x38] sm:$0xff] %v1571_v59  ;;  %v1575_v61 = vld [vmem:[%s2571_s29 + $0x48] sm:$0xff]  ;;  %v1577_v62 = vld [vmem:[%s2571_s29 + $0x50] sm:$0xff]  ;;  %s1950_s13 = sshll.u32 %s3394_s10, 9  ;;  %s3380_s24 = smov %s3394_s10 }
 0x3b1   : >> { %1574 = vst [vmem:[%s2567_s26 + $0x40] sm:$0xff] %v1573_v60  ;;  %v1579_v63 = vld [vmem:[%s2571_s29 + $0x58] sm:$0xff]  ;;  %1576 = vst [vmem:[%s2567_s26 + $0x48] sm:$0xff] %v1575_v61  ;;  %v1581_v6 = vld [vmem:[%s2571_s29 + $0x60] sm:$0xff]  ;;  %s3224_s12 = scalar_lea.vmem %s2936_s23, %s1950_s13 [#allocation2]   ;;  %s3227_s20 = scalar_lea.vmem %s2947_s11, %s1950_s13  }
 0x3b2   : >> { %1578 = vst [vmem:[%s2567_s26 + $0x50] sm:$0xff] %v1577_v62  ;;  %1580 = vst [vmem:[%s2567_s26 + $0x58] sm:$0xff] %v1579_v63  ;;  %v1583_v7 = vld [vmem:[%s2571_s29 + $0x68] sm:$0xff]  ;;  %v1585_v27 = vld [vmem:[%s2571_s29 + $0x70] sm:$0xff] }
 0x3b3   : >> { %1582 = vst [vmem:[%s2567_s26 + $0x60] sm:$0xff] %v1581_v6  ;;  %1584 = vst [vmem:[%s2567_s26 + $0x68] sm:$0xff] %v1583_v7  ;;  %v1587_v29 = vld [vmem:[%s2571_s29 + $0x78] sm:$0xff]  ;;  %v1589_v30 = vld [vmem:[%s2571_s29 + $0x80] sm:$0xff] }
 0x3b4   : >> { %1586 = vst [vmem:[%s2567_s26 + $0x70] sm:$0xff] %v1585_v27  ;;  %v1591_v8 = vld [vmem:[%s2571_s29 + $0x88] sm:$0xff]  ;;  %1588 = vst [vmem:[%s2567_s26 + $0x78] sm:$0xff] %v1587_v29  ;;  %v1593_v9 = vld [vmem:[%s2571_s29 + $0x90] sm:$0xff] }
 0x3b5   : >> { %1590 = vst [vmem:[%s2567_s26 + $0x80] sm:$0xff] %v1589_v30  ;;  %1592 = vst [vmem:[%s2567_s26 + $0x88] sm:$0xff] %v1591_v8  ;;  %v1595_v10 = vld [vmem:[%s2571_s29 + $0x98] sm:$0xff]  ;;  %v1597_v11 = vld [vmem:[%s2571_s29 + $0xa0] sm:$0xff] }
 0x3b6   : >> { %1594 = vst [vmem:[%s2567_s26 + $0x90] sm:$0xff] %v1593_v9  ;;  %1596 = vst [vmem:[%s2567_s26 + $0x98] sm:$0xff] %v1595_v10  ;;  %v1599_v13 = vld [vmem:[%s2571_s29 + $0xa8] sm:$0xff]  ;;  %v1601_v14 = vld [vmem:[%s2571_s29 + $0xb0] sm:$0xff] }
 0x3b7   : >> { %1598 = vst [vmem:[%s2567_s26 + $0xa0] sm:$0xff] %v1597_v11  ;;  %v1603_v25 = vld [vmem:[%s2571_s29 + $0xb8] sm:$0xff]  ;;  %1600 = vst [vmem:[%s2567_s26 + $0xa8] sm:$0xff] %v1599_v13  ;;  %v1605_v26 = vld [vmem:[%s2571_s29 + $0xc0] sm:$0xff] }
 0x3b8   : >> { %1602 = vst [vmem:[%s2567_s26 + $0xb0] sm:$0xff] %v1601_v14  ;;  %1604 = vst [vmem:[%s2567_s26 + $0xb8] sm:$0xff] %v1603_v25  ;;  %v1607_v28 = vld [vmem:[%s2571_s29 + $0xc8] sm:$0xff]  ;;  %v1609_v15 = vld [vmem:[%s2571_s29 + $0xd0] sm:$0xff] }
 0x3b9   : >> { %1606 = vst [vmem:[%s2567_s26 + $0xc0] sm:$0xff] %v1605_v26  ;;  %1608 = vst [vmem:[%s2567_s26 + $0xc8] sm:$0xff] %v1607_v28  ;;  %v1611_v16 = vld [vmem:[%s2571_s29 + $0xd8] sm:$0xff]  ;;  %v1613_v17 = vld [vmem:[%s2571_s29 + $0xe0] sm:$0xff] }
 0x3ba   : >> { %1610 = vst [vmem:[%s2567_s26 + $0xd0] sm:$0xff] %v1609_v15  ;;  %v1615_v57 = vld [vmem:[%s2571_s29 + $0xe8] sm:$0xff]  ;;  %1612 = vst [vmem:[%s2567_s26 + $0xd8] sm:$0xff] %v1611_v16  ;;  %v1617_v31 = vld [vmem:[%s2571_s29 + $0xf0] sm:$0xff] }
 0x3bb   : >> { %1614 = vst [vmem:[%s2567_s26 + $0xe0] sm:$0xff] %v1613_v17  ;;  %1616 = vst [vmem:[%s2567_s26 + $0xe8] sm:$0xff] %v1615_v57  ;;  %v1619_v32 = vld [vmem:[%s2571_s29 + $0xf8] sm:$0xff]  ;;  %v1621_v47 = vld [vmem:[%s2571_s29 + $0x100] sm:$0xff] }
 0x3bc   : >> { %1618 = vst [vmem:[%s2567_s26 + $0xf0] sm:$0xff] %v1617_v31  ;;  %1620 = vst [vmem:[%s2567_s26 + $0xf8] sm:$0xff] %v1619_v32  ;;  %v1623_v49 = vld [vmem:[%s2571_s29 + $0x108] sm:$0xff]  ;;  %v1625_v50 = vld [vmem:[%s2571_s29 + $0x110] sm:$0xff] }
 0x3bd   : >> { %1622 = vst [vmem:[%s2567_s26 + $0x100] sm:$0xff] %v1621_v47  ;;  %v1627_v33 = vld [vmem:[%s2571_s29 + $0x118] sm:$0xff]  ;;  %1624 = vst [vmem:[%s2567_s26 + $0x108] sm:$0xff] %v1623_v49  ;;  %v1629_v34 = vld [vmem:[%s2571_s29 + $0x120] sm:$0xff] }
 0x3be   : >> { %1626 = vst [vmem:[%s2567_s26 + $0x110] sm:$0xff] %v1625_v50  ;;  %1628 = vst [vmem:[%s2567_s26 + $0x118] sm:$0xff] %v1627_v33  ;;  %v1631_v35 = vld [vmem:[%s2571_s29 + $0x128] sm:$0xff]  ;;  %v1633_v36 = vld [vmem:[%s2571_s29 + $0x130] sm:$0xff] }
 0x3bf   : >> { %1630 = vst [vmem:[%s2567_s26 + $0x120] sm:$0xff] %v1629_v34  ;;  %1632 = vst [vmem:[%s2567_s26 + $0x128] sm:$0xff] %v1631_v35  ;;  %v1635_v37 = vld [vmem:[%s2571_s29 + $0x138] sm:$0xff]  ;;  %v1637_v38 = vld [vmem:[%s2571_s29 + $0x140] sm:$0xff] }
 0x3c0   : >> { %1634 = vst [vmem:[%s2567_s26 + $0x130] sm:$0xff] %v1633_v36  ;;  %v1639_v45 = vld [vmem:[%s2571_s29 + $0x148] sm:$0xff]  ;;  %1636 = vst [vmem:[%s2567_s26 + $0x138] sm:$0xff] %v1635_v37  ;;  %v1641_v46 = vld [vmem:[%s2571_s29 + $0x150] sm:$0xff] }
 0x3c1   : >> { %1638 = vst [vmem:[%s2567_s26 + $0x140] sm:$0xff] %v1637_v38  ;;  %1640 = vst [vmem:[%s2567_s26 + $0x148] sm:$0xff] %v1639_v45  ;;  %v1643_v48 = vld [vmem:[%s2571_s29 + $0x158] sm:$0xff]  ;;  %v1645_v39 = vld [vmem:[%s2571_s29 + $0x160] sm:$0xff] }
 0x3c2   : >> { %1642 = vst [vmem:[%s2567_s26 + $0x150] sm:$0xff] %v1641_v46  ;;  %1644 = vst [vmem:[%s2567_s26 + $0x158] sm:$0xff] %v1643_v48  ;;  %v1647_v40 = vld [vmem:[%s2571_s29 + $0x168] sm:$0xff]  ;;  %v1649_v41 = vld [vmem:[%s2571_s29 + $0x170] sm:$0xff] }
 0x3c3   : >> { %1646 = vst [vmem:[%s2567_s26 + $0x160] sm:$0xff] %v1645_v39  ;;  %v1651_v42 = vld [vmem:[%s2571_s29 + $0x178] sm:$0xff]  ;;  %1648 = vst [vmem:[%s2567_s26 + $0x168] sm:$0xff] %v1647_v40  ;;  %v1653_v43 = vld [vmem:[%s2571_s29 + $0x180] sm:$0xff] }
 0x3c4   : >> { %1650 = vst [vmem:[%s2567_s26 + $0x170] sm:$0xff] %v1649_v41  ;;  %1652 = vst [vmem:[%s2567_s26 + $0x178] sm:$0xff] %v1651_v42  ;;  %v1655_v44 = vld [vmem:[%s2571_s29 + $0x188] sm:$0xff]  ;;  %v1657_v2 = vld [vmem:[%s2571_s29 + $0x190] sm:$0xff] }
 0x3c5   : >> { %1654 = vst [vmem:[%s2567_s26 + $0x180] sm:$0xff] %v1653_v43  ;;  %1656 = vst [vmem:[%s2567_s26 + $0x188] sm:$0xff] %v1655_v44  ;;  %v1659_v4 = vld [vmem:[%s2571_s29 + $0x198] sm:$0xff]  ;;  %v1661_v5 = vld [vmem:[%s2571_s29 + $0x1a0] sm:$0xff] }
 0x3c6   : >> { %1658 = vst [vmem:[%s2567_s26 + $0x190] sm:$0xff] %v1657_v2  ;;  %v1663_v51 = vld [vmem:[%s2571_s29 + $0x1a8] sm:$0xff]  ;;  %1660 = vst [vmem:[%s2567_s26 + $0x198] sm:$0xff] %v1659_v4  ;;  %v1665_v52 = vld [vmem:[%s2571_s29 + $0x1b0] sm:$0xff]  ;;  %1553 = sbr.rel (!%p1550_p7) target bundleno = 940 (0x3ac), region = 184 }
 0x3c7   : >> { %1662 = vst [vmem:[%s2567_s26 + $0x1a0] sm:$0xff] %v1661_v5  ;;  %1664 = vst [vmem:[%s2567_s26 + $0x1a8] sm:$0xff] %v1663_v51  ;;  %v1667_v53 = vld [vmem:[%s2571_s29 + $0x1b8] sm:$0xff]  ;;  %v1669_v54 = vld [vmem:[%s2571_s29 + $0x1c0] sm:$0xff] }
 0x3c8   : >> { %1666 = vst [vmem:[%s2567_s26 + $0x1b0] sm:$0xff] %v1665_v52  ;;  %1668 = vst [vmem:[%s2567_s26 + $0x1b8] sm:$0xff] %v1667_v53  ;;  %v1671_v55 = vld [vmem:[%s2571_s29 + $0x1c8] sm:$0xff]  ;;  %v1673_v12 = vld [vmem:[%s2571_s29 + $0x1d0] sm:$0xff] }
 0x3c9   : >> { %1670 = vst [vmem:[%s2567_s26 + $0x1c0] sm:$0xff] %v1669_v54  ;;  %v1675_v0 = vld [vmem:[%s2571_s29 + $0x1d8] sm:$0xff]  ;;  %1672 = vst [vmem:[%s2567_s26 + $0x1c8] sm:$0xff] %v1671_v55  ;;  %v1677_v1 = vld [vmem:[%s2571_s29 + $0x1e0] sm:$0xff] }
 0x3ca   : >> { %1674 = vst [vmem:[%s2567_s26 + $0x1d0] sm:$0xff] %v1673_v12  ;;  %1676 = vst [vmem:[%s2567_s26 + $0x1d8] sm:$0xff] %v1675_v0  ;;  %v1679_v3 = vld [vmem:[%s2571_s29 + $0x1e8] sm:$0xff]  ;;  %v1681_v56 = vld [vmem:[%s2571_s29 + $0x1f0] sm:$0xff] }
 0x3cb   : >> { %1678 = vst [vmem:[%s2567_s26 + $0x1e0] sm:$0xff] %v1677_v1  ;;  %1680 = vst [vmem:[%s2567_s26 + $0x1e8] sm:$0xff] %v1679_v3  ;;  %v1683_v22 = vld [vmem:[%s2571_s29 + $0x1f8] sm:$0xff]  ;;  %s3379_s29 = smov %s3224_s12 }
 0x3cc   : >> { %1682 = vst [vmem:[%s2567_s26 + $0x1f0] sm:$0xff] %v1681_v56  ;;  %1684 = vst [vmem:[%s2567_s26 + $0x1f8] sm:$0xff] %v1683_v22  ;;  %s3378_s26 = smov %s3227_s20 }
 0x3cd PF: > { %s3333_s19 = sand.u32 63, %s1544_s17   ;;  %s1965_s27 = sshll.u32 %s3157_s22, 13 }
 0x3ce   : > { %s1696_s15 = sshra.s32 %s1965_s27, 4  ;;  %p1955_p8 = scmp.le.s32.totalorder %s3333_s19, 0 }
 0x3cf   : > { %s1697_s13 = scalar_lea.vmem %s2936_s23, %s1696_s15 [#allocation2]   ;;  %s1700_s21 = scalar_lea.vmem %s2947_s11, %s1696_s15  }
 0x3d0   : > { %1836 = sbr.rel (%p1955_p8) target bundleno = 993 (0x3e1), region = 189  ;;  %s2581_s12 = smov (!%p1955_p8), %s1700_s21  }
 0x3d1   : > { %s2585_s10 = smov (!%p1955_p8), %s1697_s13   ;;  %s2589_s20 = smov (!%p1955_p8), 0  }
 0x3d2   : > { %s2593_s30 = smov (!%p1955_p8), 0  }
 0x3d7 LB: >> { %v1712_v18 = vld [vmem:[%s2587_s10] sm:$0xff]  ;;  %s1714_s17 = sadd.s32 1, %s2591_s20  ;;  %s1706_s30 = sadd.s32 1, %s2595_s30   ;;  %s2595_s30 = sphi %s2593_s30, %s1706_s30   ;;  %s2591_s20 = sphi %s2589_s20, %s2590_s20   ;;  %s2587_s10 = sphi %s2585_s10, %s1719_s10   ;;  %s2583_s12 = sphi %s2581_s12, %s1720_s12  }
 0x3d8   : >> { %1713 = vst [vmem:[%s2583_s12] sm:$0xff] %v1712_v18  ;;  %p1715_p9 = scmp.ge.s32.totalorder %s1714_s17, %s3333_s19  ;;  %p1705_p10 = scmp.ge.s32.totalorder %s1706_s30, %s3333_s19 }
 0x3da   : >> { %s3396_s17 = smov (%p1715_p9, %s1714_s17), 0  ;;  %1708 = sbr.rel (!%p1705_p10) target bundleno = 983 (0x3d7), region = 195 }
 0x3db   : >> { %s1956_s22 = sshll.u32 %s3396_s17, 3  ;;  %s2590_s20 = smov %s3396_s17  }
 0x3dc   : >> { %s1719_s10 = scalar_lea.vmem %s1697_s13, %s1956_s22 [#allocation2]   ;;  %s1720_s12 = scalar_lea.vmem %s1700_s21, %s1956_s22  }
 0x3e1 PF: > { %s2598_s26 = smov 0   ;;  %s3381_s24 = scalar_lea.vmem %s2947_s11, %s3148_s16 }
 0x3e2   : > { %s1721_s29 = sshllo.u32 %s2598_s26, %s2953_s9 }
 0x3e3   : > { %v1730_v19 = vld [vmem:[%s1541_s18] sm:%s1721_s29] }
 0x3e4   : > { %1731 = vst [vmem:[%s3381_s24] sm:%s1721_s29] %v1730_v19 }
 0x3e5 PF: > { %p1958_p11 = scmp.ge.u32.totalorder %s2949_s14, 8 }
 0x3e6   : > { %s2599_s27 = smov (!%p1958_p11), 0  }
 0x3e7   : > { %1342 = sbr.rel (%p1958_p11) target bundleno = 1006 (0x3ee), region = 64  ;;  %s1343_s21 = sshllo.u32 (!%p1958_p11), %s2599_s27, %s2949_s14 }
 0x3e8   : > { %v1352_v20 = vld [vmem:[%s2936_s23] sm:%s1343_s21] (!%p1958_p11) }
 0x3e9   : > { %1353 = vst [vmem:[%s2947_s11] sm:%s1343_s21] (!%p1958_p11), %v1352_v20 }
 0x3ee PF: > { %p14_p12 = scmp.ge.s32.totalorder %s2655_s28, 4   ;;  %s3382_s24 = smov %s2527_s25 }
 0x3ef   : > { %s3383_s25 = smov %s2663_s8  ;;  %s3384_s26 = smov %s2655_s28 }
 0x3f0   :  { %16 = sbr.rel (!%p14_p12) target bundleno = 2 (0x2), region = 206 }

</bundles_post_ra>
